<compile_context>
chip_gen: v6e
topology: v6e:2x2x1
jax: 0.10.0
libtpu: 0.0.40
codegen_flags: <defaults>
</compile_context>

<pallas_src>
import functools

import jax
import jax.numpy as jnp
import numpy as np
from jax.experimental import pallas as pl
from jax.experimental.pallas import tpu as pltpu

LN_EPS = 1e-5
NEG_INF = -1e30
PRECISION = jax.lax.Precision.HIGHEST


def _layer_norm_f32(x, gamma, beta):
    """LayerNorm over the last axis in f32 (biased variance, like torch.nn.LayerNorm)."""
    x = x.astype(jnp.float32)
    mean = jnp.mean(x, axis=-1, keepdims=True)
    var = jnp.mean(jnp.square(x - mean), axis=-1, keepdims=True)
    return (x - mean) * jax.lax.rsqrt(var + LN_EPS) * gamma + beta


def _dot(a, b):
    """a @ b with f32 accumulation and highest available MXU precision."""
    return jnp.dot(a, b, precision=PRECISION, preferred_element_type=jnp.float32)


def _dot_nt(a, b):
    """a (m, e) contracted with b (n, e) -> (m, n), f32 accumulation (no explicit .T)."""
    return jax.lax.dot_general(a, b, (((1,), (1,)), ((), ())),
                               precision=PRECISION,
                               preferred_element_type=jnp.float32)


def _mha_kernel(q_ref, k_ref, v_ref, wq_ref, wk_ref, wv_ref, wo_ref,
                gamma_ref, beta_ref, bias_ref, out_ref, kh_scr, vh_scr,
                *, n_head, d_inner, pre_lnorm):
    # Grid = (B, num_q_tiles); this invocation handles batch b = program_id(0),
    # query-time tile i = program_id(1).
    #   q_ref:        (tile_t, D)   query rows of this batch/tile
    #   k_ref, v_ref: (Tk, D)       all key/value rows of this batch (constant over i)
    #   wq/wk/wv_ref: (D, H*dh)     fused projection weights
    #   wo_ref:       (H*dh, D)     output projection weight
    #   bias_ref:     (tile_t, Tk)  additive user mask (0 allowed / -1e30 masked)
    #   kh_scr/vh_scr:(Tk, H*dh)    VMEM scratch holding projected K/V for this batch
    H, dh = n_head, d_inner
    in_dtype = q_ref.dtype
    i = pl.program_id(1)
    scale = 1.0 / (dh ** 0.5)

    gamma = gamma_ref[...].astype(jnp.float32)   # (1, D)
    beta = beta_ref[...].astype(jnp.float32)     # (1, D)

    # ---- K/V projection hoisted out of the query-tile loop: once per batch element.
    @pl.when(i == 0)
    def _project_kv():
        k = k_ref[...]
        v = v_ref[...]
        if pre_lnorm:
            k = _layer_norm_f32(k, gamma, beta).astype(in_dtype)
            v = _layer_norm_f32(v, gamma, beta).astype(in_dtype)
        kh_scr[...] = _dot(k, wk_ref[...]).astype(kh_scr.dtype)   # (Tk, H*dh)
        vh_scr[...] = _dot(v, wv_ref[...]).astype(vh_scr.dtype)   # (Tk, H*dh)

    # ---- Fused Q projection: one (tile_t, D) @ (D, H*dh) matmul, full output lanes.
    q = q_ref[...]
    if pre_lnorm:
        q = _layer_norm_f32(q, gamma, beta).astype(in_dtype)
    qh = _dot(q, wq_ref[...]).astype(in_dtype)                    # (tile_t, H*dh)

    kh = kh_scr[...]                                              # (Tk, H*dh)
    vh = vh_scr[...]                                              # (Tk, H*dh)
    bias = bias_ref[...].astype(jnp.float32)                      # (tile_t, Tk)

    # ---- Per-head scaled dot-product attention. Heads are static lane slices of the
    # fused projections (same MXU shapes as a batched-head einsum, no 3-D relayouts).
    head_outs = []
    for h in range(H):
        lo, hi = h * dh, (h + 1) * dh
        s = _dot_nt(qh[:, lo:hi], kh[:, lo:hi]) * scale + bias    # (tile_t, Tk) f32
        m = jnp.max(s, axis=-1, keepdims=True)
        p = jnp.exp(s - m)
        p = p / jnp.sum(p, axis=-1, keepdims=True)                # exact normalization
        head_outs.append(_dot(p.astype(in_dtype), vh[:, lo:hi]))  # (tile_t, dh) f32
    attn_vec = jnp.concatenate(head_outs, axis=-1).astype(in_dtype)  # (tile_t, H*dh)

    # ---- Output projection (+ post-LayerNorm).
    out = _dot(attn_vec, wo_ref[...])                             # (tile_t, D) f32
    if not pre_lnorm:
        out = _layer_norm_f32(out, gamma, beta)
    out_ref[...] = out.astype(out_ref.dtype)


def _pick_q_tile(Tq):
    """Query-time tile: the whole axis when small, otherwise the largest multiple-of-8
    divisor <= 128 (keeps the (8,128) BlockSpec constraint satisfied)."""
    if Tq <= 128:
        return Tq
    for t in (128, 64, 32, 16, 8):
        if Tq % t == 0:
            return t
    return Tq


@functools.partial(jax.jit, static_argnames=("n_head", "d_inner", "pre_lnorm"))
def multihead_attention(q, k, v, attn_mask, params, *, n_head, d_inner,
                        pre_lnorm=False):
    """q: (Tq, B, D), k/v: (Tk, B, D), attn_mask: (Tq, Tk) bool-like (True = masked)
    or None. Returns (Tq, B, D)."""
    Tq, B, D = q.shape
    Tk = k.shape[0]
    H, dh = n_head, d_inner
    HD = H * dh

    # Batch-major views: one small O(T*B*D) XLA transpose each, which buys a fully
    # per-batch kernel (no O((T*B)^2) mask bias, no cross-batch masking, no wasted
    # score flops).
    qb = jnp.transpose(q, (1, 0, 2))   # (B, Tq, D)
    kb = jnp.transpose(k, (1, 0, 2))   # (B, Tk, D)
    vb = jnp.transpose(v, (1, 0, 2))   # (B, Tk, D)

    # Fused projection weights (stored as (in_features, out_features): y = x @ W).
    wq = params["wq"].reshape(D, HD)
    wk = params["wk"].reshape(D, HD)
    wv = params["wv"].reshape(D, HD)
    wo = params["wo"].reshape(HD, D)
    gamma = params["ln_gamma"].reshape(1, D)
    beta = params["ln_beta"].reshape(1, D)

    # Additive user-mask bias: only O(Tq * Tk), shared by every batch element.
    if attn_mask is None:
        bias = jnp.zeros((Tq, Tk), jnp.float32)
    else:
        bias = jnp.where(attn_mask.astype(bool),
                         jnp.float32(NEG_INF), jnp.float32(0.0))

    tile_t = _pick_q_tile(Tq)
    grid = (B, Tq // tile_t)

    kernel = functools.partial(_mha_kernel, n_head=H, d_inner=dh,
                               pre_lnorm=pre_lnorm)

    out_b = pl.pallas_call(
        kernel,
        out_shape=jax.ShapeDtypeStruct((B, Tq, D), q.dtype),
        grid=grid,
        in_specs=[
            pl.BlockSpec((None, tile_t, D), lambda b, i: (b, i, 0)),  # q tile
            pl.BlockSpec((None, Tk, D), lambda b, i: (b, 0, 0)),      # k (per batch)
            pl.BlockSpec((None, Tk, D), lambda b, i: (b, 0, 0)),      # v (per batch)
            pl.BlockSpec((D, HD), lambda b, i: (0, 0)),               # Wq fused
            pl.BlockSpec((D, HD), lambda b, i: (0, 0)),               # Wk fused
            pl.BlockSpec((D, HD), lambda b, i: (0, 0)),               # Wv fused
            pl.BlockSpec((HD, D), lambda b, i: (0, 0)),               # Wo
            pl.BlockSpec((1, D), lambda b, i: (0, 0)),                # LN gamma
            pl.BlockSpec((1, D), lambda b, i: (0, 0)),                # LN beta
            pl.BlockSpec((tile_t, Tk), lambda b, i: (i, 0)),          # mask bias
        ],
        out_specs=pl.BlockSpec((None, tile_t, D), lambda b, i: (b, i, 0)),
        scratch_shapes=[pltpu.VMEM((Tk, HD), q.dtype),    # projected K (per batch)
                        pltpu.VMEM((Tk, HD), q.dtype)],   # projected V (per batch)
        # The query-tile axis carries the K/V scratch -> "arbitrary"; the batch axis
        # is independent and feeds megacore.
        compiler_params=pltpu.CompilerParams(
            dimension_semantics=("parallel", "arbitrary")),
    )(qb, kb, vb, wq, wk, wv, wo, gamma, beta, bias)

    return jnp.transpose(out_b, (1, 0, 2))


def _reference(q, k, v, attn_mask, params, *, n_head, d_inner, pre_lnorm=False):
    """Plain-JAX mirror of the PyTorch forward (eval mode), highest matmul precision."""
    gamma = params["ln_gamma"]
    beta = params["ln_beta"]

    def ln(x):
        m = x.mean(-1, keepdims=True)
        var = ((x - m) ** 2).mean(-1, keepdims=True)
        return (x - m) / jnp.sqrt(var + LN_EPS) * gamma + beta

    def mm(a, b):
        return jnp.matmul(a, b, precision=PRECISION)

    if pre_lnorm:
        qp, kp, vp = mm(ln(q), params["wq"]), mm(ln(k), params["wk"]), mm(ln(v), params["wv"])
    else:
        qp, kp, vp = mm(q, params["wq"]), mm(k, params["wk"]), mm(v, params["wv"])

    Tq, B, _ = q.shape
    Tk = k.shape[0]
    qh = qp.reshape(Tq, B, n_head, d_inner)
    kh = kp.reshape(Tk, B, n_head, d_inner)
    vh = vp.reshape(Tk, B, n_head, d_inner)

    score = jnp.einsum("ibnd,jbnd->ijbn", qh, kh, precision=PRECISION) * (1.0 / d_inner ** 0.5)
    if attn_mask is not None:
        score = jnp.where(attn_mask[:, :, None, None], jnp.float32(NEG_INF), score)
    prob = jax.nn.softmax(score, axis=1)
    vec = jnp.einsum("ijbn,jbnd->ibnd", prob, vh,
                     precision=PRECISION).reshape(Tq, B, n_head * d_inner)
    out = mm(vec, params["wo"])
    if not pre_lnorm:
        out = ln(out)
    return out


if __name__ == "__main__":
    # cfg: d_model=32, num_heads=4, d_inner=8
    D_MODEL, N_HEAD, D_INNER = 32, 4, 8
    T, B = 8, 2
    HD = N_HEAD * D_INNER

    key = jax.random.PRNGKey(0)
    ks = jax.random.split(key, 8)
    scale_in = 1.0 / np.sqrt(D_MODEL)
    scale_hd = 1.0 / np.sqrt(HD)

    params = {
        # weights stored as (in_features, out_features), i.e. y = x @ W
        "wq": jax.random.uniform(ks[0], (D_MODEL, HD), jnp.float32, -scale_in, scale_in),
        "wk": jax.random.uniform(ks[1], (D_MODEL, HD), jnp.float32, -scale_in, scale_in),
        "wv": jax.random.uniform(ks[2], (D_MODEL, HD), jnp.float32, -scale_in, scale_in),
        "wo": jax.random.uniform(ks[3], (HD, D_MODEL), jnp.float32, -scale_hd, scale_hd),
        "ln_gamma": jnp.ones((D_MODEL,), jnp.float32),
        "ln_beta": jnp.zeros((D_MODEL,), jnp.float32),
    }

    q = jax.random.normal(ks[4], (T, B, D_MODEL), jnp.float32)
    k = jax.random.normal(ks[5], (T, B, D_MODEL), jnp.float32)
    v = jax.random.normal(ks[6], (T, B, D_MODEL), jnp.float32)
    # causal mask: True above the diagonal (masked out)
    attn_mask = jnp.triu(jnp.ones((T, T), jnp.bool_), k=1)

    for pre_lnorm in (False, True):
        out = multihead_attention(q, k, v, attn_mask, params,
                                  n_head=N_HEAD, d_inner=D_INNER,
                                  pre_lnorm=pre_lnorm)
        out = jax.block_until_ready(out)
        ref = _reference(q, k, v, attn_mask, params,
                         n_head=N_HEAD, d_inner=D_INNER, pre_lnorm=pre_lnorm)
        # Tolerance covers TPU MXU default-precision (single-pass bf16) f32 matmuls in
        # case a backend ignores the HIGHEST precision hint; with it honored (or in
        # interpret mode) the agreement is ~1e-6.
        np.testing.assert_allclose(np.asarray(out), np.asarray(ref),
                                   atol=2e-2, rtol=2e-2)

    print("KERNEL_OK")
</pallas_src>

<mosaic_0001>
module attributes {stable_mosaic.version = 11 : i64} {
  func.func @_mha_kernel(%arg0: i32, %arg1: i32, %arg2: memref<1x8x32xf32, #tpu.memory_space<vmem>>, %arg3: memref<1x8x32xf32, #tpu.memory_space<vmem>>, %arg4: memref<1x8x32xf32, #tpu.memory_space<vmem>>, %arg5: memref<32x32xf32, #tpu.memory_space<vmem>>, %arg6: memref<32x32xf32, #tpu.memory_space<vmem>>, %arg7: memref<32x32xf32, #tpu.memory_space<vmem>>, %arg8: memref<32x32xf32, #tpu.memory_space<vmem>>, %arg9: memref<1x32xf32, #tpu.memory_space<vmem>>, %arg10: memref<1x32xf32, #tpu.memory_space<vmem>>, %arg11: memref<8x8xf32, #tpu.memory_space<vmem>>, %arg12: memref<1x8x32xf32, #tpu.memory_space<vmem>>, %arg13: memref<8x32xf32, #tpu.memory_space<vmem>>, %arg14: memref<8x32xf32, #tpu.memory_space<vmem>>) attributes {dimension_semantics = [#tpu.dimension_semantics<parallel>, #tpu.dimension_semantics<arbitrary>], iteration_bounds = array<i64: 2, 1>, scalar_prefetch = 0 : i64, scratch_operands = 2 : i64, tpu.core_type = #tpu.core_type<tc>, window_params = [{transform_indices = @transform_0, window_bounds = array<i64: 1, 8, 32>}, {transform_indices = @transform_1, window_bounds = array<i64: 1, 8, 32>}, {transform_indices = @transform_2, window_bounds = array<i64: 1, 8, 32>}, {pipeline_mode = #tpu.pipeline_mode<synchronous>, transform_indices = @transform_3, window_bounds = array<i64: 32, 32>}, {pipeline_mode = #tpu.pipeline_mode<synchronous>, transform_indices = @transform_4, window_bounds = array<i64: 32, 32>}, {pipeline_mode = #tpu.pipeline_mode<synchronous>, transform_indices = @transform_5, window_bounds = array<i64: 32, 32>}, {pipeline_mode = #tpu.pipeline_mode<synchronous>, transform_indices = @transform_6, window_bounds = array<i64: 32, 32>}, {pipeline_mode = #tpu.pipeline_mode<synchronous>, transform_indices = @transform_7, window_bounds = array<i64: 1, 32>}, {pipeline_mode = #tpu.pipeline_mode<synchronous>, transform_indices = @transform_8, window_bounds = array<i64: 1, 32>}, {transform_indices = @transform_9, window_bounds = array<i64: 8, 8>}, {transform_indices = @transform_10, window_bounds = array<i64: 1, 8, 32>}]} {
    %c0 = arith.constant 0 : index
    %c0_0 = arith.constant 0 : index
    %0 = vector.load %arg9[%c0, %c0_0] : memref<1x32xf32, #tpu.memory_space<vmem>>, vector<1x32xf32>
    %c0_1 = arith.constant 0 : index
    %c0_2 = arith.constant 0 : index
    %1 = vector.load %arg10[%c0_1, %c0_2] : memref<1x32xf32, #tpu.memory_space<vmem>>, vector<1x32xf32>
    %c0_i32 = arith.constant 0 : i32
    %2 = arith.cmpi eq, %arg1, %c0_i32 : i32
    %3 = arith.extui %2 : i1 to i32
    %c0_i32_3 = arith.constant 0 : i32
    %4 = arith.cmpi ne, %3, %c0_i32_3 : i32
    scf.if %4 {
      %c0_46 = arith.constant 0 : index
      %c0_47 = arith.constant 0 : index
      %c0_48 = arith.constant 0 : index
      %108 = vector.load %arg3[%c0_46, %c0_47, %c0_48] : memref<1x8x32xf32, #tpu.memory_space<vmem>>, vector<1x8x32xf32>
      %109 = vector.shape_cast %108 : vector<1x8x32xf32> to vector<8x32xf32>
      %c0_49 = arith.constant 0 : index
      %c0_50 = arith.constant 0 : index
      %c0_51 = arith.constant 0 : index
      %110 = vector.load %arg4[%c0_49, %c0_50, %c0_51] : memref<1x8x32xf32, #tpu.memory_space<vmem>>, vector<1x8x32xf32>
      %111 = vector.shape_cast %110 : vector<1x8x32xf32> to vector<8x32xf32>
      %c0_52 = arith.constant 0 : index
      %c0_53 = arith.constant 0 : index
      %112 = vector.load %arg6[%c0_52, %c0_53] : memref<32x32xf32, #tpu.memory_space<vmem>>, vector<32x32xf32>
      %cst_54 = arith.constant dense<0.000000e+00> : vector<8x32xf32>
      %113 = tpu.matmul %109, %112, %cst_54 {dimension_numbers = #tpu.dot_dimension_numbers<[1], [0], [0], [1], [0, 0, 1, 1], [], []>, precision = #tpu.contract_precision<fp32>} : vector<8x32xf32>, vector<32x32xf32>, vector<8x32xf32> -> vector<8x32xf32>
      %c0_55 = arith.constant 0 : index
      %c0_56 = arith.constant 0 : index
      %114 = vector.load %arg13[%c0_55, %c0_56] : memref<8x32xf32, #tpu.memory_space<vmem>>, vector<8x32xf32>
      tpu.vector_store %arg13[%c0_55, %c0_56], %113 {strides = array<i32>} : memref<8x32xf32, #tpu.memory_space<vmem>>, vector<8x32xf32>,
      %c0_57 = arith.constant 0 : index
      %c0_58 = arith.constant 0 : index
      %115 = vector.load %arg7[%c0_57, %c0_58] : memref<32x32xf32, #tpu.memory_space<vmem>>, vector<32x32xf32>
      %cst_59 = arith.constant dense<0.000000e+00> : vector<8x32xf32>
      %116 = tpu.matmul %111, %115, %cst_59 {dimension_numbers = #tpu.dot_dimension_numbers<[1], [0], [0], [1], [0, 0, 1, 1], [], []>, precision = #tpu.contract_precision<fp32>} : vector<8x32xf32>, vector<32x32xf32>, vector<8x32xf32> -> vector<8x32xf32>
      %c0_60 = arith.constant 0 : index
      %c0_61 = arith.constant 0 : index
      %117 = vector.load %arg14[%c0_60, %c0_61] : memref<8x32xf32, #tpu.memory_space<vmem>>, vector<8x32xf32>
      tpu.vector_store %arg14[%c0_60, %c0_61], %116 {strides = array<i32>} : memref<8x32xf32, #tpu.memory_space<vmem>>, vector<8x32xf32>,
    } else {
    }
    %c0_4 = arith.constant 0 : index
    %c0_5 = arith.constant 0 : index
    %c0_6 = arith.constant 0 : index
    %5 = vector.load %arg2[%c0_4, %c0_5, %c0_6] : memref<1x8x32xf32, #tpu.memory_space<vmem>>, vector<1x8x32xf32>
    %6 = vector.shape_cast %5 : vector<1x8x32xf32> to vector<8x32xf32>
    %c0_7 = arith.constant 0 : index
    %c0_8 = arith.constant 0 : index
    %7 = vector.load %arg5[%c0_7, %c0_8] : memref<32x32xf32, #tpu.memory_space<vmem>>, vector<32x32xf32>
    %cst = arith.constant dense<0.000000e+00> : vector<8x32xf32>
    %8 = tpu.matmul %6, %7, %cst {dimension_numbers = #tpu.dot_dimension_numbers<[1], [0], [0], [1], [0, 0, 1, 1], [], []>, precision = #tpu.contract_precision<fp32>} : vector<8x32xf32>, vector<32x32xf32>, vector<8x32xf32> -> vector<8x32xf32>
    %c0_9 = arith.constant 0 : index
    %c0_10 = arith.constant 0 : index
    %9 = vector.load %arg13[%c0_9, %c0_10] : memref<8x32xf32, #tpu.memory_space<vmem>>, vector<8x32xf32>
    %c0_11 = arith.constant 0 : index
    %c0_12 = arith.constant 0 : index
    %10 = vector.load %arg14[%c0_11, %c0_12] : memref<8x32xf32, #tpu.memory_space<vmem>>, vector<8x32xf32>
    %c0_13 = arith.constant 0 : index
    %c0_14 = arith.constant 0 : index
    %11 = vector.load %arg11[%c0_13, %c0_14] : memref<8x8xf32, #tpu.memory_space<vmem>>, vector<8x8xf32>
    %12 = vector.extract_strided_slice %8 {offsets = [0, 0], sizes = [8, 8], strides = [1, 1]} : vector<8x32xf32> to vector<8x8xf32>
    %13 = vector.extract_strided_slice %9 {offsets = [0, 0], sizes = [8, 8], strides = [1, 1]} : vector<8x32xf32> to vector<8x8xf32>
    %cst_15 = arith.constant dense<0.000000e+00> : vector<8x8xf32>
    %14 = tpu.matmul %12, %13, %cst_15 {dimension_numbers = #tpu.dot_dimension_numbers<[1], [1], [0], [0], [0, 0, 1, 0], [], []>, precision = #tpu.contract_precision<fp32>} : vector<8x8xf32>, vector<8x8xf32>, vector<8x8xf32> -> vector<8x8xf32>
    %cst_16 = arith.constant 0.353553385 : f32
    %15 = vector.broadcast %cst_16 : f32 to vector<8x8xf32>
    %16 = arith.mulf %14, %15 : vector<8x8xf32>
    %17 = arith.addf %16, %11 : vector<8x8xf32>
    %cst_17 = arith.constant dense<0xFF800000> : vector<8xf32>
    %18 = vector.multi_reduction <maximumf>, %17, %cst_17 [1] : vector<8x8xf32> to vector<8xf32>
    %19 = vector.shape_cast %18 : vector<8xf32> to vector<8x1xf32>
    %20 = vector.broadcast %19 : vector<8x1xf32> to vector<8x8xf32>
    %21 = arith.subf %17, %20 : vector<8x8xf32>
    %22 = math.exp %21 : vector<8x8xf32>
    %cst_18 = arith.constant dense<0.000000e+00> : vector<8xf32>
    %23 = vector.multi_reduction <add>, %22, %cst_18 [1] : vector<8x8xf32> to vector<8xf32>
    %24 = vector.shape_cast %23 : vector<8xf32> to vector<8x1xf32>
    %25 = vector.broadcast %24 : vector<8x1xf32> to vector<8x8xf32>
    %26 = arith.divf %22, %25 : vector<8x8xf32>
    %27 = vector.extract_strided_slice %10 {offsets = [0, 0], sizes = [8, 8], strides = [1, 1]} : vector<8x32xf32> to vector<8x8xf32>
    %cst_19 = arith.constant dense<0.000000e+00> : vector<8x8xf32>
    %28 = tpu.matmul %26, %27, %cst_19 {dimension_numbers = #tpu.dot_dimension_numbers<[1], [0], [0], [1], [0, 0, 1, 1], [], []>, precision = #tpu.contract_precision<fp32>} : vector<8x8xf32>, vector<8x8xf32>, vector<8x8xf32> -> vector<8x8xf32>
    %29 = vector.extract_strided_slice %8 {offsets = [0, 8], sizes = [8, 8], strides = [1, 1]} : vector<8x32xf32> to vector<8x8xf32>
    %30 = vector.extract_strided_slice %9 {offsets = [0, 8], sizes = [8, 8], strides = [1, 1]} : vector<8x32xf32> to vector<8x8xf32>
    %cst_20 = arith.constant dense<0.000000e+00> : vector<8x8xf32>
    %31 = tpu.matmul %29, %30, %cst_20 {dimension_numbers = #tpu.dot_dimension_numbers<[1], [1], [0], [0], [0, 0, 1, 0], [], []>, precision = #tpu.contract_precision<fp32>} : vector<8x8xf32>, vector<8x8xf32>, vector<8x8xf32> -> vector<8x8xf32>
    %cst_21 = arith.constant 0.353553385 : f32
    %32 = vector.broadcast %cst_21 : f32 to vector<8x8xf32>
    %33 = arith.mulf %31, %32 : vector<8x8xf32>
    %34 = arith.addf %33, %11 : vector<8x8xf32>
    %cst_22 = arith.constant dense<0xFF800000> : vector<8xf32>
    %35 = vector.multi_reduction <maximumf>, %34, %cst_22 [1] : vector<8x8xf32> to vector<8xf32>
    %36 = vector.shape_cast %35 : vector<8xf32> to vector<8x1xf32>
    %37 = vector.broadcast %36 : vector<8x1xf32> to vector<8x8xf32>
    %38 = arith.subf %34, %37 : vector<8x8xf32>
    %39 = math.exp %38 : vector<8x8xf32>
    %cst_23 = arith.constant dense<0.000000e+00> : vector<8xf32>
    %40 = vector.multi_reduction <add>, %39, %cst_23 [1] : vector<8x8xf32> to vector<8xf32>
    %41 = vector.shape_cast %40 : vector<8xf32> to vector<8x1xf32>
    %42 = vector.broadcast %41 : vector<8x1xf32> to vector<8x8xf32>
    %43 = arith.divf %39, %42 : vector<8x8xf32>
    %44 = vector.extract_strided_slice %10 {offsets = [0, 8], sizes = [8, 8], strides = [1, 1]} : vector<8x32xf32> to vector<8x8xf32>
    %cst_24 = arith.constant dense<0.000000e+00> : vector<8x8xf32>
    %45 = tpu.matmul %43, %44, %cst_24 {dimension_numbers = #tpu.dot_dimension_numbers<[1], [0], [0], [1], [0, 0, 1, 1], [], []>, precision = #tpu.contract_precision<fp32>} : vector<8x8xf32>, vector<8x8xf32>, vector<8x8xf32> -> vector<8x8xf32>
    %46 = vector.extract_strided_slice %8 {offsets = [0, 16], sizes = [8, 8], strides = [1, 1]} : vector<8x32xf32> to vector<8x8xf32>
    %47 = vector.extract_strided_slice %9 {offsets = [0, 16], sizes = [8, 8], strides = [1, 1]} : vector<8x32xf32> to vector<8x8xf32>
    %cst_25 = arith.constant dense<0.000000e+00> : vector<8x8xf32>
    %48 = tpu.matmul %46, %47, %cst_25 {dimension_numbers = #tpu.dot_dimension_numbers<[1], [1], [0], [0], [0, 0, 1, 0], [], []>, precision = #tpu.contract_precision<fp32>} : vector<8x8xf32>, vector<8x8xf32>, vector<8x8xf32> -> vector<8x8xf32>
    %cst_26 = arith.constant 0.353553385 : f32
    %49 = vector.broadcast %cst_26 : f32 to vector<8x8xf32>
    %50 = arith.mulf %48, %49 : vector<8x8xf32>
    %51 = arith.addf %50, %11 : vector<8x8xf32>
    %cst_27 = arith.constant dense<0xFF800000> : vector<8xf32>
    %52 = vector.multi_reduction <maximumf>, %51, %cst_27 [1] : vector<8x8xf32> to vector<8xf32>
    %53 = vector.shape_cast %52 : vector<8xf32> to vector<8x1xf32>
    %54 = vector.broadcast %53 : vector<8x1xf32> to vector<8x8xf32>
    %55 = arith.subf %51, %54 : vector<8x8xf32>
    %56 = math.exp %55 : vector<8x8xf32>
    %cst_28 = arith.constant dense<0.000000e+00> : vector<8xf32>
    %57 = vector.multi_reduction <add>, %56, %cst_28 [1] : vector<8x8xf32> to vector<8xf32>
    %58 = vector.shape_cast %57 : vector<8xf32> to vector<8x1xf32>
    %59 = vector.broadcast %58 : vector<8x1xf32> to vector<8x8xf32>
    %60 = arith.divf %56, %59 : vector<8x8xf32>
    %61 = vector.extract_strided_slice %10 {offsets = [0, 16], sizes = [8, 8], strides = [1, 1]} : vector<8x32xf32> to vector<8x8xf32>
    %cst_29 = arith.constant dense<0.000000e+00> : vector<8x8xf32>
    %62 = tpu.matmul %60, %61, %cst_29 {dimension_numbers = #tpu.dot_dimension_numbers<[1], [0], [0], [1], [0, 0, 1, 1], [], []>, precision = #tpu.contract_precision<fp32>} : vector<8x8xf32>, vector<8x8xf32>, vector<8x8xf32> -> vector<8x8xf32>
    %63 = vector.extract_strided_slice %8 {offsets = [0, 24], sizes = [8, 8], strides = [1, 1]} : vector<8x32xf32> to vector<8x8xf32>
    %64 = vector.extract_strided_slice %9 {offsets = [0, 24], sizes = [8, 8], strides = [1, 1]} : vector<8x32xf32> to vector<8x8xf32>
    %cst_30 = arith.constant dense<0.000000e+00> : vector<8x8xf32>
    %65 = tpu.matmul %63, %64, %cst_30 {dimension_numbers = #tpu.dot_dimension_numbers<[1], [1], [0], [0], [0, 0, 1, 0], [], []>, precision = #tpu.contract_precision<fp32>} : vector<8x8xf32>, vector<8x8xf32>, vector<8x8xf32> -> vector<8x8xf32>
    %cst_31 = arith.constant 0.353553385 : f32
    %66 = vector.broadcast %cst_31 : f32 to vector<8x8xf32>
    %67 = arith.mulf %65, %66 : vector<8x8xf32>
    %68 = arith.addf %67, %11 : vector<8x8xf32>
    %cst_32 = arith.constant dense<0xFF800000> : vector<8xf32>
    %69 = vector.multi_reduction <maximumf>, %68, %cst_32 [1] : vector<8x8xf32> to vector<8xf32>
    %70 = vector.shape_cast %69 : vector<8xf32> to vector<8x1xf32>
    %71 = vector.broadcast %70 : vector<8x1xf32> to vector<8x8xf32>
    %72 = arith.subf %68, %71 : vector<8x8xf32>
    %73 = math.exp %72 : vector<8x8xf32>
    %cst_33 = arith.constant dense<0.000000e+00> : vector<8xf32>
    %74 = vector.multi_reduction <add>, %73, %cst_33 [1] : vector<8x8xf32> to vector<8xf32>
    %75 = vector.shape_cast %74 : vector<8xf32> to vector<8x1xf32>
    %76 = vector.broadcast %75 : vector<8x1xf32> to vector<8x8xf32>
    %77 = arith.divf %73, %76 : vector<8x8xf32>
    %78 = vector.extract_strided_slice %10 {offsets = [0, 24], sizes = [8, 8], strides = [1, 1]} : vector<8x32xf32> to vector<8x8xf32>
    %cst_34 = arith.constant dense<0.000000e+00> : vector<8x8xf32>
    %79 = tpu.matmul %77, %78, %cst_34 {dimension_numbers = #tpu.dot_dimension_numbers<[1], [0], [0], [1], [0, 0, 1, 1], [], []>, precision = #tpu.contract_precision<fp32>} : vector<8x8xf32>, vector<8x8xf32>, vector<8x8xf32> -> vector<8x8xf32>
    %80 = tpu.concatenate %28, %45, %62, %79 in 1 : vector<8x8xf32>, vector<8x8xf32>, vector<8x8xf32>, vector<8x8xf32> -> vector<8x32xf32>
    %c0_35 = arith.constant 0 : index
    %c0_36 = arith.constant 0 : index
    %81 = vector.load %arg8[%c0_35, %c0_36] : memref<32x32xf32, #tpu.memory_space<vmem>>, vector<32x32xf32>
    %cst_37 = arith.constant dense<0.000000e+00> : vector<8x32xf32>
    %82 = tpu.matmul %80, %81, %cst_37 {dimension_numbers = #tpu.dot_dimension_numbers<[1], [0], [0], [1], [0, 0, 1, 1], [], []>, precision = #tpu.contract_precision<fp32>} : vector<8x32xf32>, vector<32x32xf32>, vector<8x32xf32> -> vector<8x32xf32>
    %cst_38 = arith.constant dense<0.000000e+00> : vector<8xf32>
    %83 = vector.multi_reduction <add>, %82, %cst_38 [1] : vector<8x32xf32> to vector<8xf32>
    %84 = vector.shape_cast %83 : vector<8xf32> to vector<8x1xf32>
    %cst_39 = arith.constant 3.200000e+01 : f32
    %85 = vector.broadcast %cst_39 : f32 to vector<8x1xf32>
    %86 = arith.divf %84, %85 : vector<8x1xf32>
    %87 = vector.broadcast %86 : vector<8x1xf32> to vector<8x32xf32>
    %88 = arith.subf %82, %87 : vector<8x32xf32>
    %89 = arith.mulf %88, %88 : vector<8x32xf32>
    %cst_40 = arith.constant dense<0.000000e+00> : vector<8xf32>
    %90 = vector.multi_reduction <add>, %89, %cst_40 [1] : vector<8x32xf32> to vector<8xf32>
    %91 = vector.shape_cast %90 : vector<8xf32> to vector<8x1xf32>
    %cst_41 = arith.constant 3.200000e+01 : f32
    %92 = vector.broadcast %cst_41 : f32 to vector<8x1xf32>
    %93 = arith.divf %91, %92 : vector<8x1xf32>
    %94 = vector.broadcast %86 : vector<8x1xf32> to vector<8x32xf32>
    %95 = arith.subf %82, %94 : vector<8x32xf32>
    %cst_42 = arith.constant 9.99999974E-6 : f32
    %96 = vector.broadcast %cst_42 : f32 to vector<8x1xf32>
    %97 = arith.addf %93, %96 : vector<8x1xf32>
    %98 = math.rsqrt %97 : vector<8x1xf32>
    %99 = vector.broadcast %98 : vector<8x1xf32> to vector<8x32xf32>
    %100 = arith.mulf %95, %99 : vector<8x32xf32>
    %101 = vector.broadcast %0 : vector<1x32xf32> to vector<8x32xf32>
    %102 = arith.mulf %100, %101 : vector<8x32xf32>
    %103 = vector.broadcast %1 : vector<1x32xf32> to vector<8x32xf32>
    %104 = arith.addf %102, %103 : vector<8x32xf32>
    %c0_43 = arith.constant 0 : index
    %c0_44 = arith.constant 0 : index
    %c0_45 = arith.constant 0 : index
    %105 = vector.load %arg12[%c0_43, %c0_44, %c0_45] : memref<1x8x32xf32, #tpu.memory_space<vmem>>, vector<1x8x32xf32>
    %106 = vector.shape_cast %105 : vector<1x8x32xf32> to vector<8x32xf32>
    %107 = vector.shape_cast %104 : vector<8x32xf32> to vector<1x8x32xf32>
    tpu.vector_store %arg12[%c0_43, %c0_44, %c0_45], %107 {strides = array<i32>} : memref<1x8x32xf32, #tpu.memory_space<vmem>>, vector<1x8x32xf32>,
    return
  }
  func.func @transform_0(%arg0: i32, %arg1: i32) -> (i32, i32, i32) {
    %c0_i32 = arith.constant 0 : i32
    %c0_i32_0 = arith.constant 0 : i32
    return %arg0, %arg1, %c0_i32 : i32, i32, i32
  }
  func.func @transform_1(%arg0: i32, %arg1: i32) -> (i32, i32, i32) {
    %c0_i32 = arith.constant 0 : i32
    %c0_i32_0 = arith.constant 0 : i32
    %c0_i32_1 = arith.constant 0 : i32
    return %arg0, %c0_i32, %c0_i32_0 : i32, i32, i32
  }
  func.func @transform_2(%arg0: i32, %arg1: i32) -> (i32, i32, i32) {
    %c0_i32 = arith.constant 0 : i32
    %c0_i32_0 = arith.constant 0 : i32
    %c0_i32_1 = arith.constant 0 : i32
    return %arg0, %c0_i32, %c0_i32_0 : i32, i32, i32
  }
  func.func @transform_3(%arg0: i32, %arg1: i32) -> (i32, i32) {
    %c0_i32 = arith.constant 0 : i32
    %c0_i32_0 = arith.constant 0 : i32
    %c0_i32_1 = arith.constant 0 : i32
    return %c0_i32, %c0_i32_0 : i32, i32
  }
  func.func @transform_4(%arg0: i32, %arg1: i32) -> (i32, i32) {
    %c0_i32 = arith.constant 0 : i32
    %c0_i32_0 = arith.constant 0 : i32
    %c0_i32_1 = arith.constant 0 : i32
    return %c0_i32, %c0_i32_0 : i32, i32
  }
  func.func @transform_5(%arg0: i32, %arg1: i32) -> (i32, i32) {
    %c0_i32 = arith.constant 0 : i32
    %c0_i32_0 = arith.constant 0 : i32
    %c0_i32_1 = arith.constant 0 : i32
    return %c0_i32, %c0_i32_0 : i32, i32
  }
  func.func @transform_6(%arg0: i32, %arg1: i32) -> (i32, i32) {
    %c0_i32 = arith.constant 0 : i32
    %c0_i32_0 = arith.constant 0 : i32
    %c0_i32_1 = arith.constant 0 : i32
    return %c0_i32, %c0_i32_0 : i32, i32
  }
  func.func @transform_7(%arg0: i32, %arg1: i32) -> (i32, i32) {
    %c0_i32 = arith.constant 0 : i32
    %c0_i32_0 = arith.constant 0 : i32
    %c0_i32_1 = arith.constant 0 : i32
    return %c0_i32, %c0_i32_0 : i32, i32
  }
  func.func @transform_8(%arg0: i32, %arg1: i32) -> (i32, i32) {
    %c0_i32 = arith.constant 0 : i32
    %c0_i32_0 = arith.constant 0 : i32
    %c0_i32_1 = arith.constant 0 : i32
    return %c0_i32, %c0_i32_0 : i32, i32
  }
  func.func @transform_9(%arg0: i32, %arg1: i32) -> (i32, i32) {
    %c0_i32 = arith.constant 0 : i32
    %c0_i32_0 = arith.constant 0 : i32
    return %arg1, %c0_i32 : i32, i32
  }
  func.func @transform_10(%arg0: i32, %arg1: i32) -> (i32, i32, i32) {
    %c0_i32 = arith.constant 0 : i32
    %c0_i32_0 = arith.constant 0 : i32
    return %arg0, %arg1, %c0_i32 : i32, i32, i32
  }
}

</mosaic_0001>

<bundles_post_ra>
// kernel: multihead_attention.1
= control target key start
LH: loop header
LB: loop body
LE: loop exit
PB: predicated region body
PF: predicated region fallthrough
CT: control target
= control target key end

     0   :  { %15 = vsyncpa [#allocation5], 0  ;;  %s7200_s13 = smov 0   ;;  %s7202_s14 = smov 0   ;;  %s7971_s0 = inlined_call_operand.vmem [shape: f32[2,8,32], index: 0, kind: input, shape index: {}]   ;;  %s7972_s1 = inlined_call_operand.vmem [shape: f32[2,8,32], index: 1, kind: input, shape index: {}]   ;;  %s7973_s2 = inlined_call_operand.vmem [shape: f32[2,8,32], index: 2, kind: input, shape index: {}]   ;;  %s7974_s3 = inlined_call_operand.vmem [shape: f32[32,32], index: 3, kind: input, shape index: {}]   ;;  %s7975_s4 = inlined_call_operand.vmem [shape: f32[32,32], index: 4, kind: input, shape index: {}]   ;;  %s7976_s5 = inlined_call_operand.vmem [shape: f32[32,32], index: 5, kind: input, shape index: {}]   ;;  %s7977_s6 = inlined_call_operand.hbm [shape: f32[32,32], index: 6, kind: input, shape index: {}]   ;;  %s7978_s7 = inlined_call_operand.vmem [shape: f32[1,32], index: 7, kind: input, shape index: {}]   ;;  %s7979_s8 = inlined_call_operand.vmem [shape: f32[1,32], index: 8, kind: input, shape index: {}]   ;;  %s7980_s9 = inlined_call_operand.vmem [shape: f32[8,8], index: 9, kind: input, shape index: {}]   ;;  %s7981_s10 = inlined_call_operand.vmem [shape: f32[2,8,32], index: 10, kind: output, shape index: {}]  }
   0x1   :  { %s7204_s15 = smov 0  }
   0x2 LB: > { %s6281_s16 = sadd.s32 4294967295, %s7132_s15   ;;  %s33_s17 = sadd.s32 1, %s7128_s14  ;;  %s7132_s15 = sphi %s7204_s15, %s21_s15   ;;  %s7128_s14 = sphi %s7202_s14, %s7985_s14   ;;  %s7124_s13 = sphi %s7200_s13, %s7984_s13  }
   0x3   : > { %p35_p0 = scmp.ge.s32.totalorder %s33_s17, 2  ;;  %p6283_p1 = scmp.ge.s32.totalorder %s7132_s15, 1 }
   0x4   : > { %p298_p2 = scmp.lt.s32.totalorder %s7132_s15, 3  ;;  %p7225_p4 = scmp.eq.s32.totalorder %s6281_s16, 0 }
   0x5   : > { %s7987_s17 = smov (%p35_p0, %s33_s17), 0  ;;  %s7134_s20 = smov [#allocation4]  }
   0x6   : > { %p7221_p3 = pnand %p6283_p1, %p298_p2  ;;  %s319_s21 = sshll.u32 %s7134_s20, 4  ;;  %s320_s21 = int_to_ptr.vmem [resolvable:$true] %s319_s21 }
   0x7   : > { %s7091_s22 = scalar_lea.vmem %s320_s21, 512  ;;  %p7099_p11 = scmp.lt.s32.totalorder %s320_s21, %s320_s21 }
   0x8   : > { %p7021_p5 = pneg %p7221_p3  ;;  %p7092_p8 = scmp.ne.s32.totalorder %s320_s21, %s7091_s22 }
   0x9   : > { %p7100_p12 = scmp.lt.s32.totalorder %s7091_s22, %s7091_s22 }
   0xa   : > { %p7022_p6 = pnand %p7225_p4, %p7021_p5 }
   0xb   : > { %p7101_p13 = por %p7100_p12, %p7099_p11 }
   0xc   : > { %p7082_p7 = pneg %p7022_p6 }
   0xe   : > { %p7094_p9 = pnand %p7092_p8, %p7082_p7 }
  0x10   : > { %p7095_p10 = pneg %p7094_p9 }
  0x12   : > { %p7102_p0 = pnand %p7101_p13, %p7095_p10 }
  0x14   : > { %7105 = shalt.err (!%p7102_p0)
}
  0x15   : > { %s7135_s23 = smov 128   ;;  %s7136_s24 = smov 8  }
  0x16   : > { %7024 = dma.hbm_to_vmem [thread:$0]  (!%p7022_p6), %s7977_s6, 512, %s320_s21, [#allocation5], %s7135_s23, %s7135_s23, %s7136_s24  }
  0x17   : > { %372 = sbr.rel (%p7221_p3) target bundleno = 3355 (0xd1b), region = 60 }
  0x1c   : > { %7119 = dma.done.wait (%p7225_p4), [#allocation5], 512  }
  0x1d   : > { %7121 = vsyncadd (%p7225_p4), [#allocation5], 4294966784  ;;  %p426_p1 = scmp.lt.s32.totalorder %s7124_s13, 1  ;;  %v7137_v0 = vmov 0.0   ;;  %vm7138_vm0 = vmmov 0   ;;  %vm464_vm1 = vcmask 261120  }
  0x1e   : > { %6513 = vmatprep.subr.mxu0 %v7137_v0  ;;  %6524 = vmatprep.subr.mxu1 %v7137_v0  ;;  %v463_v1 = vld [vmem:[%s7975_s4 + $0x18] sm:$0xff]  ;;  %v462_v2 = vld [vmem:[%s7975_s4 + $0x10] sm:$0xff]  ;;  %v461_v3 = vld [vmem:[%s7975_s4 + $0x8] sm:$0xff]  ;;  %vm1944_vm2 = vcmask 64512   ;;  %s7139_s29 = smov 120   ;;  %s7140_s12 = smov 112  }
  0x1f   : > { %6521 = vmatprep.mubr.msk.f32.mxu0 %vm7138_vm0, %v7137_v0  ;;  %s7989_s13 = smov (!%p426_p1, %s7124_s13), 1  ;;  %6532 = vmatprep.mubr.msk.f32.mxu1 %vm7138_vm0, %v7137_v0  ;;  %v7265_v4 = vand.u32 4294901760, %v463_v1  ;;  %v7267_v5 = vand.u32 4294901760, %v462_v2  ;;  %v7269_v6 = vand.u32 4294901760, %v461_v3  ;;  %v460_v7 = vld [vmem:[%s7975_s4] sm:$0xff]  ;;  %v957_v33 = vld [vmem:[%s7976_s5 + $0x18] sm:$0xff] }
  0x20   : > { %s7250_s27 = sshll.u32 %s7989_s13, 3  ;;  %v7274_v9 = vand.u32 4294901760, %v460_v7  ;;  %v7333_v35 = vand.u32 4294901760, %v957_v33  ;;  %v956_v36 = vld [vmem:[%s7976_s5 + $0x10] sm:$0xff]  ;;  %v955_v37 = vld [vmem:[%s7976_s5 + $0x8] sm:$0xff]  ;;  %v954_v41 = vld [vmem:[%s7976_s5] sm:$0xff] }
  0x21   : > { %s436_s30 = scalar_lea.vmem %s7972_s1, %s7250_s27  ;;  %6514 = vmatpush3.msra.mxu0 %v7265_v4  ;;  %v573_v11 = vsub.f32 %v463_v1, %v7265_v4  ;;  %v7282_v13 = vsub.f32 %v462_v2, %v7267_v5  ;;  %v7285_v14 = vsub.f32 %v461_v3, %v7269_v6  ;;  %s440_s24 = scalar_lea.vmem %s7973_s2, %s7250_s27  ;;  %v7348_v39 = vand.u32 4294901760, %v956_v36  ;;  %v1451_v1 = vld [vmem:[%s7974_s3 + $0x18] sm:$0xff] }
  0x22   : > { %v458_v8 = vld [vmem:[%s436_s30] sm:$0xff]  ;;  %6515 = vmatprep.subr.mxu0 %v7137_v0  ;;  %v7289_v15 = vsub.f32 %v460_v7, %v7274_v9  ;;  %v7353_v40 = vsub.f32 %v957_v33, %v7333_v35  ;;  %v7359_v42 = vand.u32 4294901760, %v955_v37  ;;  %v7372_v45 = vand.u32 4294901760, %v954_v41  ;;  %s432_s20 = scalar_lea.vmem %s7971_s0, %s7250_s27  ;;  %s7141_s16 = smov 104  }
  0x23   : > { %v466_v10 = vsel %vm464_vm1, %v458_v8, 0  ;;  %6516 = vmatpush3.msra.mxu0 %v7267_v5  ;;  %v574_v16 = vand.u32 4294901760, %v573_v11  ;;  %v581_v18 = vand.u32 4294901760, %v7282_v13  ;;  %v588_v19 = vand.u32 4294901760, %v7285_v14  ;;  %v459_v32 = vld [vmem:[%s440_s24] sm:$0xff]  ;;  %s7142_s18 = smov 8   ;;  %s451_s26 = scalar_lea.vmem %s7981_s10, %s7250_s27 }
  0x24   : > { %v7279_v12 = vand.u32 4294901760, %v466_v10  ;;  %6517 = vmatprep.subr.mxu0 %v7137_v0  ;;  %v595_v20 = vand.u32 4294901760, %v7289_v15  ;;  %v959_v34 = vsel %vm464_vm1, %v459_v32, 0  ;;  %v7370_v44 = vsub.f32 %v956_v36, %v7348_v39  ;;  %v1447_v63 = vld [vmem:[%s432_s20] sm:$0xff]  ;;  %s7143_s19 = smov 16   ;;  %s7144_s20 = smov 24  }
  0x25   : > { %6518 = vmatpush3.msra.mxu0 %v7269_v6  ;;  %v575_v21 = vsub.f32 %v573_v11, %v574_v16  ;;  %v582_v23 = vsub.f32 %v7282_v13, %v581_v18  ;;  %v589_v24 = vsub.f32 %v7285_v14, %v588_v19  ;;  %v7345_v38 = vand.u32 4294901760, %v959_v34 }
  0x26   : > { %v7293_v17 = vsub.f32 %v466_v10, %v7279_v12  ;;  %6519 = vmatprep.subr.mxu0 %v7137_v0  ;;  %v596_v28 = vsub.f32 %v7289_v15, %v595_v20  ;;  %v1067_v46 = vand.u32 4294901760, %v7353_v40  ;;  %v7380_v47 = vsub.f32 %v955_v37, %v7359_v42 }
  0x27   : > { %6520 = vmatpush3.msra.mxu0 %v7274_v9  ;;  %v576_v25 = vand.u32 4294901760, %v575_v21  ;;  %v583_v27 = vand.u32 4294901760, %v582_v23  ;;  %v590_v30 = vand.u32 4294901760, %v589_v24  ;;  %v7364_v43 = vsub.f32 %v959_v34, %v7345_v38 }
  0x28   : > { %v539_v22 = vand.u32 4294901760, %v7293_v17  ;;  %6535 = vmatprep.subr.mxu0 %v7137_v0  ;;  %v597_v31 = vand.u32 4294901760, %v596_v28  ;;  %v7390_v49 = vsub.f32 %v954_v41, %v7372_v45  ;;  %v1074_v50 = vand.u32 4294901760, %v7370_v44 }
  0x29   : > { %6525 = vmatpush3.msra.mxu1 %v576_v25  ;;  %v1032_v48 = vand.u32 4294901760, %v7364_v43  ;;  %v1068_v51 = vsub.f32 %v7353_v40, %v1067_v46  ;;  %v1081_v52 = vand.u32 4294901760, %v7380_v47  ;;  %v1454_v2 = vsel %vm464_vm1, %v1447_v63, 0 }
  0x2a   : > { %v540_v26 = vsub.f32 %v7293_v17, %v539_v22  ;;  %6526 = vmatprep.subr.mxu1 %v7137_v0  ;;  %v1075_v54 = vsub.f32 %v7370_v44, %v1074_v50  ;;  %v1088_v55 = vand.u32 4294901760, %v7390_v49  ;;  %v7455_v3 = vand.u32 4294901760, %v1451_v1 }
  0x2b   : > { %6527 = vmatpush3.msra.mxu1 %v583_v27  ;;  %v1033_v53 = vsub.f32 %v7364_v43, %v1032_v48  ;;  %v1069_v56 = vand.u32 4294901760, %v1068_v51  ;;  %v1082_v57 = vsub.f32 %v7380_v47, %v1081_v52  ;;  %vm5630_vm3 = vcmask 130048  }
  0x2c   : > { %v541_v29 = vand.u32 4294901760, %v540_v26  ;;  %6528 = vmatprep.subr.mxu1 %v7137_v0  ;;  %v1076_v59 = vand.u32 4294901760, %v1075_v54  ;;  %v1089_v60 = vsub.f32 %v7390_v49, %v1088_v55  ;;  %v7477_v8 = vsub.f32 %v1451_v1, %v7455_v3 }
  0x2d   : > { %6529 = vmatpush3.msra.mxu1 %v590_v30  ;;  %v1034_v58 = vand.u32 4294901760, %v1033_v53  ;;  %v1083_v61 = vand.u32 4294901760, %v1082_v57  ;;  %vm5632_vm4 = vcmask 195584  }
  0x2e   : > { %6522 = vmatmul.mubr.f32.vlgmr.msra.gmra.mxu0 %v541_v29  ;;  %6530 = vmatprep.subr.mxu1 %v7137_v0  ;;  %v1090_v62 = vand.u32 4294901760, %v1089_v60 }
  0x2f   : > { %6536 = vmatpush3.msra.mxu0 %v573_v11  ;;  %6531 = vmatpush3.msra.mxu1 %v597_v31 }
  0x30   : > { %6537 = vmatprep.subr.mxu0 %v7137_v0  ;;  %6533 = vmatmul.mubr.f32.vlgmr.msra.gmra.mxu1 %v7279_v12 }
  0x31   : > { %6538 = vmatpush3.msra.mxu0 %v7282_v13  ;;  %6546 = vmatprep.subr.mxu1 %v7137_v0 }
  0x32   : > { %6539 = vmatprep.subr.mxu0 %v7137_v0  ;;  %6543 = vmatprep.mubr.msk.f32.mxu0 %vm7138_vm0, %v7137_v0 }
  0x33   : > { %6540 = vmatpush3.msra.mxu0 %v7285_v14  ;;  %6547 = vmatpush3.msra.mxu1 %v7265_v4  ;;  %v1562_v14 = vand.u32 4294901760, %v7477_v8 }
  0x34   : > { %6541 = vmatprep.subr.mxu0 %v7137_v0  ;;  %6548 = vmatprep.subr.mxu1 %v7137_v0 }
  0x35   : > { %6542 = vmatpush3.msra.mxu0 %v7289_v15  ;;  %6549 = vmatpush3.msra.mxu1 %v7267_v5 }
  0x36   : > { %6544 = vmatmul.mubr.f32.vlgmr.msra.gmra.mxu0 %v7293_v17  ;;  %6557 = vmatprep.subr.mxu0 %v7137_v0 }
  0x37   : > { %6558 = vmatpush3.msra.mxu0 %v574_v16  ;;  %6550 = vmatprep.subr.mxu1 %v7137_v0 }
  0x38   : > { %6559 = vmatprep.subr.mxu0 %v7137_v0  ;;  %6551 = vmatpush3.msra.mxu1 %v7269_v6 }
  0x39   : > { %6560 = vmatpush3.msra.mxu0 %v581_v18  ;;  %6552 = vmatprep.subr.mxu1 %v7137_v0 }
  0x3a   : > { %6561 = vmatprep.subr.mxu0 %v7137_v0  ;;  %6553 = vmatpush3.msra.mxu1 %v7274_v9 }
  0x3b   : > { %6554 = vmatprep.mubr.msk.f32.mxu1 %vm7138_vm0, %v7137_v0  ;;  %6562 = vmatpush3.msra.mxu0 %v588_v19  ;;  %v1563_v19 = vsub.f32 %v7477_v8, %v1562_v14 }
  0x3c   : > { %6555 = vmatmul.mubr.f32.vlgmr.msra.gmra.mxu1 %v539_v22  ;;  %6563 = vmatprep.subr.mxu0 %v7137_v0 }
  0x3d   : > { %6568 = vmatprep.subr.mxu1 %v7137_v0  ;;  %6564 = vmatpush3.msra.mxu0 %v595_v20  ;;  %v1564_v24 = vand.u32 4294901760, %v1563_v19 }
  0x3e   : > { %6565 = vmatprep.mubr.msk.f32.mxu0 %vm7138_vm0, %v7137_v0  ;;  %6569 = vmatpush3.msra.mxu1 %v7265_v4  ;;  %v1450_v4 = vld [vmem:[%s7974_s3 + $0x10] sm:$0xff] }
  0x3f   : > { %6566 = vmatmul.mubr.f32.vlgmr.msra.gmra.mxu0 %v7279_v12  ;;  %6570 = vmatprep.subr.mxu1 %v7137_v0  ;;  %v7472_v7 = vand.u32 4294901760, %v1450_v4 }
  0x40   : > { %6579 = vmatprep.subr.mxu0 %v7137_v0  ;;  %6571 = vmatpush3.msra.mxu1 %v7267_v5  ;;  %v1449_v5 = vld [vmem:[%s7974_s3 + $0x8] sm:$0xff] }
  0x41   : > { %6580 = vmatpush3.msra.mxu0 %v7333_v35  ;;  %6572 = vmatprep.subr.mxu1 %v7137_v0  ;;  %v7485_v10 = vand.u32 4294901760, %v1449_v5 }
  0x42   : > { %6581 = vmatprep.subr.mxu0 %v7137_v0  ;;  %6573 = vmatpush3.msra.mxu1 %v7269_v6  ;;  %v7467_v6 = vand.u32 4294901760, %v1454_v2 }
  0x43   : > { %6582 = vmatpush3.msra.mxu0 %v7348_v39  ;;  %6574 = vmatprep.subr.mxu1 %v7137_v0  ;;  %v7508_v15 = vsub.f32 %v1449_v5, %v7485_v10 }
  0x44   : > { %6583 = vmatprep.subr.mxu0 %v7137_v0  ;;  %6575 = vmatpush3.msra.mxu1 %v7274_v9  ;;  %v1448_v9 = vld [vmem:[%s7974_s3] sm:$0xff]  ;;  %v7490_v11 = vsub.f32 %v1454_v2, %v7467_v6 }
  0x45   : > { %6576 = vmatprep.mubr.msk.f32.mxu1 %vm7138_vm0, %v7137_v0  ;;  %6584 = vmatpush3.msra.mxu0 %v7359_v42  ;;  %v7498_v13 = vand.u32 4294901760, %v1448_v9  ;;  %v1576_v20 = vand.u32 4294901760, %v7508_v15 }
  0x46   : > { %6577 = vmatmul.mubr.f32.vlgmr.msra.gmra.mxu1 %v7279_v12  ;;  %6585 = vmatprep.subr.mxu0 %v7137_v0  ;;  %v7496_v12 = vsub.f32 %v1450_v4, %v7472_v7  ;;  %v1527_v16 = vand.u32 4294901760, %v7490_v11 }
  0x47   : > { %6590 = vmatprep.subr.mxu1 %v7137_v0  ;;  %6586 = vmatpush3.msra.mxu0 %v7372_v45  ;;  %v7518_v17 = vsub.f32 %v1448_v9, %v7498_v13  ;;  %v1577_v25 = vsub.f32 %v7508_v15, %v1576_v20 }
  0x48   : > { %6591 = vmatpush3.msra.mxu1 %v1069_v56  ;;  %6587 = vmatprep.mubr.msk.f32.mxu0 %vm7138_vm0, %v7137_v0  ;;  %v1569_v18 = vand.u32 4294901760, %v7496_v12  ;;  %v1528_v21 = vsub.f32 %v7490_v11, %v1527_v16 }
  0x49   : > { %6592 = vmatprep.subr.mxu1 %v7137_v0  ;;  %6601 = vmatprep.subr.mxu0 %v7137_v0  ;;  %v1583_v23 = vand.u32 4294901760, %v7518_v17  ;;  %v1578_v29 = vand.u32 4294901760, %v1577_v25 }
  0x4a   : > { %6588 = vmatmul.mubr.f32.vlgmr.msra.gmra.mxu0 %v1034_v58  ;;  %6593 = vmatpush3.msra.mxu1 %v1076_v59  ;;  %v1570_v22 = vsub.f32 %v7496_v12, %v1569_v18  ;;  %v1529_v26 = vand.u32 4294901760, %v1528_v21 }
  0x4b   : > { %6602 = vmatpush3.msra.mxu0 %v7353_v40  ;;  %6594 = vmatprep.subr.mxu1 %v7137_v0  ;;  %v1584_v28 = vsub.f32 %v7518_v17, %v1583_v23 }
  0x4c   : > { %6603 = vmatprep.subr.mxu0 %v7137_v0  ;;  %6595 = vmatpush3.msra.mxu1 %v1083_v61  ;;  %v1571_v27 = vand.u32 4294901760, %v1570_v22 }
  0x4d   : > { %6604 = vmatpush3.msra.mxu0 %v7370_v44  ;;  %6596 = vmatprep.subr.mxu1 %v7137_v0  ;;  %v1585_v30 = vand.u32 4294901760, %v1584_v28 }
  0x4e   : > { %6605 = vmatprep.subr.mxu0 %v7137_v0  ;;  %6597 = vmatpush3.msra.mxu1 %v1090_v62 }
  0x4f   : > { %6598 = vmatprep.mubr.msk.f32.mxu1 %vm7138_vm0, %v7137_v0  ;;  %6606 = vmatpush3.msra.mxu0 %v7380_v47 }
  0x50   : > { %6599 = vmatmul.mubr.f32.vlgmr.msra.gmra.mxu1 %v7345_v38  ;;  %6607 = vmatprep.subr.mxu0 %v7137_v0 }
  0x51   : > { %6612 = vmatprep.subr.mxu1 %v7137_v0  ;;  %6608 = vmatpush3.msra.mxu0 %v7390_v49 }
  0x52   : > { %6609 = vmatprep.mubr.msk.f32.mxu0 %vm7138_vm0, %v7137_v0  ;;  %6613 = vmatpush3.msra.mxu1 %v7333_v35 }
  0x53   : > { %6610 = vmatmul.mubr.f32.vlgmr.msra.gmra.mxu0 %v7364_v43  ;;  %6614 = vmatprep.subr.mxu1 %v7137_v0 }
  0x54   : > { %6623 = vmatprep.subr.mxu0 %v7137_v0  ;;  %6615 = vmatpush3.msra.mxu1 %v7348_v39 }
  0x55   : > { %6624 = vmatpush3.msra.mxu0 %v1067_v46  ;;  %6616 = vmatprep.subr.mxu1 %v7137_v0 }
  0x56   : > { %6625 = vmatprep.subr.mxu0 %v7137_v0  ;;  %6617 = vmatpush3.msra.mxu1 %v7359_v42 }
  0x57   : > { %6626 = vmatpush3.msra.mxu0 %v1074_v50  ;;  %6618 = vmatprep.subr.mxu1 %v7137_v0 }
  0x58   : > { %6627 = vmatprep.subr.mxu0 %v7137_v0  ;;  %6619 = vmatpush3.msra.mxu1 %v7372_v45 }
  0x59   : > { %6620 = vmatprep.mubr.msk.f32.mxu1 %vm7138_vm0, %v7137_v0  ;;  %6628 = vmatpush3.msra.mxu0 %v1081_v52 }
  0x5a   : > { %6621 = vmatmul.mubr.f32.vlgmr.msra.gmra.mxu1 %v1032_v48  ;;  %6629 = vmatprep.subr.mxu0 %v7137_v0 }
  0x5b   : > { %6634 = vmatprep.subr.mxu1 %v7137_v0  ;;  %6630 = vmatpush3.msra.mxu0 %v1088_v55 }
  0x5c   : > { %6631 = vmatprep.mubr.msk.f32.mxu0 %vm7138_vm0, %v7137_v0  ;;  %6635 = vmatpush3.msra.mxu1 %v7333_v35 }
  0x5d   : > { %6632 = vmatmul.mubr.f32.vlgmr.msra.gmra.mxu0 %v7345_v38  ;;  %6636 = vmatprep.subr.mxu1 %v7137_v0 }
  0x5e   : > { %6645 = vmatprep.subr.mxu0 %v7137_v0  ;;  %6637 = vmatpush3.msra.mxu1 %v7348_v39 }
  0x5f   : > { %6646 = vmatpush3.msra.mxu0 %v7455_v3  ;;  %6638 = vmatprep.subr.mxu1 %v7137_v0 }
  0x60   : > { %6647 = vmatprep.subr.mxu0 %v7137_v0  ;;  %6639 = vmatpush3.msra.mxu1 %v7359_v42 }
  0x61   : > { %6648 = vmatpush3.msra.mxu0 %v7472_v7  ;;  %6640 = vmatprep.subr.mxu1 %v7137_v0 }
  0x62   : > { %6649 = vmatprep.subr.mxu0 %v7137_v0  ;;  %6641 = vmatpush3.msra.mxu1 %v7372_v45 }
  0x63   : > { %6642 = vmatprep.mubr.msk.f32.mxu1 %vm7138_vm0, %v7137_v0  ;;  %6650 = vmatpush3.msra.mxu0 %v7485_v10 }
  0x64   : > { %6643 = vmatmul.mubr.f32.vlgmr.msra.gmra.mxu1 %v7345_v38  ;;  %6651 = vmatprep.subr.mxu0 %v7137_v0 }
  0x65   : > { %6656 = vmatprep.subr.mxu1 %v7137_v0  ;;  %6652 = vmatpush3.msra.mxu0 %v7498_v13 }
  0x66   : > { %6657 = vmatpush3.msra.mxu1 %v1564_v24  ;;  %6653 = vmatprep.mubr.msk.f32.mxu0 %vm7138_vm0, %v7137_v0 }
  0x67   : > { %6658 = vmatprep.subr.mxu1 %v7137_v0  ;;  %6667 = vmatprep.subr.mxu0 %v7137_v0 }
  0x68   : > { %6654 = vmatmul.mubr.f32.vlgmr.msra.gmra.mxu0 %v1529_v26  ;;  %6659 = vmatpush3.msra.mxu1 %v1571_v27 }
  0x69   : > { %6668 = vmatpush3.msra.mxu0 %v7477_v8  ;;  %6660 = vmatprep.subr.mxu1 %v7137_v0 }
  0x6a   : > { %6669 = vmatprep.subr.mxu0 %v7137_v0  ;;  %6661 = vmatpush3.msra.mxu1 %v1578_v29 }
  0x6b   : > { %6670 = vmatpush3.msra.mxu0 %v7496_v12  ;;  %6662 = vmatprep.subr.mxu1 %v7137_v0 }
  0x6c   : > { %6671 = vmatprep.subr.mxu0 %v7137_v0  ;;  %6663 = vmatpush3.msra.mxu1 %v1585_v30 }
  0x6d   : > { %6664 = vmatprep.mubr.msk.f32.mxu1 %vm7138_vm0, %v7137_v0  ;;  %6672 = vmatpush3.msra.mxu0 %v7508_v15 }
  0x6e   : > { %6665 = vmatmul.mubr.f32.vlgmr.msra.gmra.mxu1 %v7467_v6  ;;  %6673 = vmatprep.subr.mxu0 %v7137_v0 }
  0x6f   : > { %6678 = vmatprep.subr.mxu1 %v7137_v0  ;;  %6674 = vmatpush3.msra.mxu0 %v7518_v17 }
  0x70   : > { %6675 = vmatprep.mubr.msk.f32.mxu0 %vm7138_vm0, %v7137_v0  ;;  %6679 = vmatpush3.msra.mxu1 %v7455_v3 }
  0x71   : > { %6676 = vmatmul.mubr.f32.vlgmr.msra.gmra.mxu0 %v7490_v11  ;;  %6680 = vmatprep.subr.mxu1 %v7137_v0 }
  0x72   : > { %6689 = vmatprep.subr.mxu0 %v7137_v0  ;;  %6681 = vmatpush3.msra.mxu1 %v7472_v7 }
  0x73   : > { %6690 = vmatpush3.msra.mxu0 %v1562_v14  ;;  %6682 = vmatprep.subr.mxu1 %v7137_v0 }
  0x74   : > { %6691 = vmatprep.subr.mxu0 %v7137_v0  ;;  %6683 = vmatpush3.msra.mxu1 %v7485_v10 }
  0x75   : > { %6692 = vmatpush3.msra.mxu0 %v1569_v18  ;;  %6684 = vmatprep.subr.mxu1 %v7137_v0 }
  0x76   : > { %6693 = vmatprep.subr.mxu0 %v7137_v0  ;;  %6685 = vmatpush3.msra.mxu1 %v7498_v13 }
  0x77   : > { %6686 = vmatprep.mubr.msk.f32.mxu1 %vm7138_vm0, %v7137_v0  ;;  %6694 = vmatpush3.msra.mxu0 %v1576_v20 }
  0x78   : > { %6687 = vmatmul.mubr.f32.vlgmr.msra.gmra.mxu1 %v1527_v16  ;;  %6695 = vmatprep.subr.mxu0 %v7137_v0 }
  0x79   : > { %6700 = vmatprep.subr.mxu1 %v7137_v0  ;;  %6696 = vmatpush3.msra.mxu0 %v1583_v23 }
  0x7a   : > { %6697 = vmatprep.mubr.msk.f32.mxu0 %vm7138_vm0, %v7137_v0  ;;  %6701 = vmatpush3.msra.mxu1 %v7455_v3 }
  0x7b   : > { %6698 = vmatmul.mubr.f32.vlgmr.msra.gmra.mxu0 %v7467_v6  ;;  %6702 = vmatprep.subr.mxu1 %v7137_v0 }
  0x7c   : > { %6708 = vmatprep.mubr.msk.f32.mxu1 %vm7138_vm0, %v7137_v0  ;;  %6703 = vmatpush3.msra.mxu1 %v7472_v7 }
  0x7d   : > { %6711 = vmatprep.subr.mxu0 %v7137_v0  ;;  %6704 = vmatprep.subr.mxu1 %v7137_v0 }
  0x7e   : > { %6713 = vmatprep.mubr.msk.f32.mxu0 %vm7138_vm0, %v7137_v0  ;;  %6705 = vmatpush3.msra.mxu1 %v7485_v10 }
  0x7f   : > { %6706 = vmatprep.subr.mxu1 %v7137_v0 }
  0x80   : > { %6707 = vmatpush3.msra.mxu1 %v7498_v13 }
  0x81   : > { %6709 = vmatmul.mubr.f32.vlgmr.msra.gmra.mxu1 %v7467_v6  ;;  %6716 = vmatprep.subr.mxu1 %v7137_v0 }
  0x82   : > { %6718 = vmatprep.mubr.msk.f32.mxu1 %vm7138_vm0, %v7137_v0 }
  0xee   : > { %v543_v31 = vpop.f32.mrf.mxu0 }
  0xf0   : > { %v6523_v32 = vpop.f32.mrf.mxu0  ;;  %v634_v33 = vpop.f32.mrf.mxu1 }
  0xf1   : > { %v635_v37 = vadd.f32 %v634_v33, %v543_v31 }
  0xf2   : > { %v6534_v34 = vpop.f32.mrf.mxu1 }
  0xf6   : > { %v714_v35 = vpop.f32.mrf.mxu0 }
  0xf7   : > { %v715_v40 = vadd.f32 %v714_v35, %v635_v37 }
  0xf8   : > { %v6545_v36 = vpop.f32.mrf.mxu0 }
  0xfc   : > { %v791_v38 = vpop.f32.mrf.mxu1 }
  0xfd   : > { %v792_v42 = vadd.f32 %v791_v38, %v715_v40 }
  0xfe   : > { %v6556_v39 = vpop.f32.mrf.mxu1 }
  0xff   : > { %v874_v41 = vpop.f32.mrf.mxu0 }
 0x100   : > { %v875_v44 = vadd.f32 %v874_v41, %v792_v42 }
 0x101   : > { %v6567_v43 = vpop.f32.mrf.mxu0 }
 0x106   : > { %v949_v45 = vpop.f32.mrf.mxu1 }
 0x107   : > { %v950_v46 = vadd.f32 %v949_v45, %v875_v44 }
 0x108   : > { %v6578_v47 = vpop.f32.mrf.mxu1 }
 0x109   : > { %953 = vst.msk [vmem:[#allocation2] sm:$0xff] %vm464_vm1, %v950_v46 }
 0x10a   : > { %v1036_v48 = vpop.f32.mrf.mxu0 }
 0x10c   : > { %v6589_v49 = vpop.f32.mrf.mxu0 }
 0x110   : > { %v1127_v50 = vpop.f32.mrf.mxu1  ;;  %v7608_v51 = vld [vmem:[#allocation2] sm:$0xff] }
 0x111   : > { %2861 = vrot.lane.b32.xlu1 %v7608_v51, %s7139_s29  ;;  %v1949_v52 = vsel %vm1944_vm2, %v7608_v51, 0  ;;  %v1128_v60 = vadd.f32 %v1127_v50, %v1036_v48 }
 0x112   : > { %v6600_v53 = vpop.f32.mrf.mxu1  ;;  %v1982_v54 = vand.u32 4294901760, %v1949_v52 }
 0x113   : > { %v1207_v55 = vpop.f32.mrf.mxu0 }
 0x114   : > { %6712 = vmatpush3.xpose.msra.mxu0 %v1982_v54  ;;  %v7614_v56 = vsub.f32 %v1949_v52, %v1982_v54  ;;  %v1208_v1 = vadd.f32 %v1207_v55, %v1128_v60 }
 0x115   : > { %v6611_v57 = vpop.f32.mrf.mxu0  ;;  %6721 = vmatprep.subr.mxu0 %v7137_v0 }
 0x116   : > { %v2060_v58 = vand.u32 4294901760, %v7614_v56 }
 0x118   : > { %v2061_v59 = vsub.f32 %v7614_v56, %v2060_v58 }
 0x11a   : > { %v1284_v61 = vpop.f32.mrf.mxu1  ;;  %v2062_v62 = vand.u32 4294901760, %v2061_v59 }
 0x11b   : > { %v1285_v3 = vadd.f32 %v1284_v61, %v1208_v1 }
 0x11c   : > { %v6622_v63 = vpop.f32.mrf.mxu1  ;;  %6717 = vmatpush3.xpose.msra.mxu1 %v2062_v62 }
 0x11d   : > { %v1367_v2 = vpop.f32.mrf.mxu0  ;;  %6726 = vmatprep.subr.mxu1 %v7137_v0 }
 0x11e   : > { %v1368_v5 = vadd.f32 %v1367_v2, %v1285_v3 }
 0x11f   : > { %v6633_v4 = vpop.f32.mrf.mxu0 }
 0x124   : > { %v1442_v6 = vpop.f32.mrf.mxu1 }
 0x125   : > { %v1443_v7 = vadd.f32 %v1442_v6, %v1368_v5 }
 0x126   : > { %v6644_v8 = vpop.f32.mrf.mxu1 }
 0x127   : > { %1446 = vst.msk [vmem:[#allocation3] sm:$0xff] %vm464_vm1, %v1443_v7 }
 0x128   : > { %v1531_v9 = vpop.f32.mrf.mxu0 }
 0x12a   : > { %v6655_v10 = vpop.f32.mrf.mxu0 }
 0x12e   : > { %v1622_v11 = vpop.f32.mrf.mxu1  ;;  %v7623_v20 = vld [vmem:[#allocation3] sm:$0xff] }
 0x12f   : > { %v1623_v15 = vadd.f32 %v1622_v11, %v1531_v9  ;;  %v7626_v23 = vand.u32 4294901760, %v7623_v20 }
 0x130   : > { %v6666_v12 = vpop.f32.mrf.mxu1 }
 0x131   : > { %v1702_v13 = vpop.f32.mrf.mxu0  ;;  %v7632_v27 = vsub.f32 %v7623_v20, %v7626_v23 }
 0x132   : > { %v1703_v18 = vadd.f32 %v1702_v13, %v1623_v15 }
 0x133   : > { %v6677_v14 = vpop.f32.mrf.mxu0  ;;  %v2522_v31 = vand.u32 4294901760, %v7632_v27 }
 0x135   : > { %v2523_v34 = vsub.f32 %v7632_v27, %v2522_v31 }
 0x137   : > { %v2524_v37 = vand.u32 4294901760, %v2523_v34 }
 0x138   : > { %v1779_v16 = vpop.f32.mrf.mxu1 }
 0x139   : > { %v1780_v21 = vadd.f32 %v1779_v16, %v1703_v18 }
 0x13a   : > { %v6688_v17 = vpop.f32.mrf.mxu1 }
 0x13b   : > { %v1862_v19 = vpop.f32.mrf.mxu0 }
 0x13c   : > { %v1863_v24 = vadd.f32 %v1862_v19, %v1780_v21 }
 0x13d   : > { %v6699_v22 = vpop.f32.mrf.mxu0 }
 0x141   : > { %v1937_v25 = vpop.f32.mrf.mxu1 }
 0x142   : > { %v7628_v26 = vadd.f32 %v1937_v25, %v1863_v24 }
 0x143   : > { %v6710_v28 = vpop.f32.mrf.mxu1 }
 0x144   : > { %2859 = vrot.lane.b32.xlu1 %v7628_v26, %s7139_s29  ;;  %v1946_v29 = vsel %vm1944_vm2, %v7628_v26, 0 }
 0x145   : > { %v2017_v30 = vand.u32 4294901760, %v1946_v29 }
 0x147   : > { %v2018_v32 = vsub.f32 %v1946_v29, %v2017_v30  ;;  %6719 = vmatmul.mubr.f32.vlgmr.msra.gmra.mxu1 %v2017_v30 }
 0x148   : > { %6727 = vmatpush3.xpose.msra.mxu1 %v1982_v54  ;;  %6728 = vmatprep.mubr.msk.f32.mxu1 %vm7138_vm0, %v7137_v0 }
 0x149   : > { %6736 = vmatprep.subr.mxu1 %v7137_v0  ;;  %v2019_v33 = vand.u32 4294901760, %v2018_v32 }
 0x14b   : > { %6729 = vmatmul.mubr.f32.vlgmr.msra.gmra.mxu1 %v2019_v33  ;;  %v2020_v35 = vsub.f32 %v2018_v32, %v2019_v33 }
 0x14c   : > { %6737 = vmatpush3.xpose.msra.mxu1 %v1982_v54  ;;  %6738 = vmatprep.mubr.msk.f32.mxu1 %vm7138_vm0, %v7137_v0 }
 0x14d   : > { %6746 = vmatprep.subr.mxu1 %v7137_v0  ;;  %v2021_v36 = vand.u32 4294901760, %v2020_v35 }
 0x14f   : > { %6714 = vmatmul.mubr.f32.vlgmr.msra.gmra.mxu0 %v2021_v36  ;;  %6739 = vmatmul.mubr.f32.vlgmr.msra.gmra.mxu1 %v2017_v30 }
 0x150   : > { %6722 = vmatpush3.xpose.msra.mxu0 %v7614_v56  ;;  %6747 = vmatpush3.msra.mxu1 %v2524_v37  ;;  %v7667_v56 = vld [vmem:[%s7980_s9] sm:$0xff] }
 0x151   : > { %6723 = vmatprep.mubr.msk.f32.mxu0 %vm7138_vm0, %v7137_v0  ;;  %6731 = vmatprep.subr.mxu0 %v7137_v0 }
 0x152   : > { %6748 = vmatprep.mubr.msk.f32.mxu1 %vm7138_vm0, %v7137_v0  ;;  %6756 = vmatprep.subr.mxu1 %v7137_v0 }
 0x153   : > { %6724 = vmatmul.mubr.f32.vlgmr.msra.gmra.mxu0 %v2018_v32 }
 0x154   : > { %6732 = vmatpush3.xpose.msra.mxu0 %v2060_v58  ;;  %6733 = vmatprep.mubr.msk.f32.mxu0 %vm7138_vm0, %v7137_v0 }
 0x155   : > { %6741 = vmatprep.subr.mxu0 %v7137_v0 }
 0x157   : > { %6734 = vmatmul.mubr.f32.vlgmr.msra.gmra.mxu0 %v2017_v30 }
 0x158   : > { %6742 = vmatpush3.msra.mxu0 %v7626_v23  ;;  %6743 = vmatprep.mubr.msk.f32.mxu0 %vm7138_vm0, %v7137_v0 }
 0x159   : > { %6751 = vmatprep.subr.mxu0 %v7137_v0 }
 0x183   : > { %v2862_v3 = vpop.permute.xlu1 %2861 }
 0x184   : > { %v2865_v4 = vsel %vm1944_vm2, %v2862_v3, 0 }
 0x185   : > { %v2898_v5 = vand.u32 4294901760, %v2865_v4 }
 0x187   : > { %v2975_v7 = vsub.f32 %v2865_v4, %v2898_v5 }
 0x189   : > { %v2976_v12 = vand.u32 4294901760, %v2975_v7 }
 0x18b   : > { %v2977_v17 = vsub.f32 %v2975_v7, %v2976_v12 }
 0x18d   : > { %v2978_v22 = vand.u32 4294901760, %v2977_v17 }
 0x1b6   : > { %v2860_v9 = vpop.permute.xlu1 %2859 }
 0x1b7   : > { %v2863_v13 = vsel %vm1944_vm2, %v2860_v9, 0 }
 0x1b8   : > { %v2933_v15 = vand.u32 4294901760, %v2863_v13 }
 0x1ba   : > { %v2934_v19 = vsub.f32 %v2863_v13, %v2933_v15 }
 0x1bc   : > { %v2935_v24 = vand.u32 4294901760, %v2934_v19 }
 0x207   : > { %v2099_v38 = vpop.f32.mrf.mxu1 }
 0x209   : > { %v6720_v39 = vpop.f32.mrf.mxu1 }
 0x20b   : > { %v2247_v40 = vpop.f32.mrf.mxu1 }
 0x20d   : > { %v6730_v41 = vpop.f32.mrf.mxu1 }
 0x20f   : > { %v2023_v42 = vpop.f32.mrf.mxu0  ;;  %v2393_v43 = vpop.f32.mrf.mxu1 }
 0x210   : > { %v2100_v46 = vadd.f32 %v2099_v38, %v2023_v42 }
 0x211   : > { %v6715_v44 = vpop.f32.mrf.mxu0  ;;  %v6740_v45 = vpop.f32.mrf.mxu1 }
 0x213   : > { %v2173_v47 = vpop.f32.mrf.mxu0 }
 0x214   : > { %v2174_v48 = vadd.f32 %v2173_v47, %v2100_v46 }
 0x215   : > { %v6725_v49 = vpop.f32.mrf.mxu0 }
 0x216   : > { %v2248_v50 = vadd.f32 %v2247_v40, %v2174_v48 }
 0x217   : > { %v2321_v52 = vpop.f32.mrf.mxu0 }
 0x218   : > { %v2322_v53 = vadd.f32 %v2321_v52, %v2248_v50 }
 0x219   : > { %v6735_v54 = vpop.f32.mrf.mxu0 }
 0x21a   : > { %v2394_v55 = vadd.f32 %v2393_v43, %v2322_v53 }
 0x21c   : > { %v2397_v57 = vmul.f32 0.35355338, %v2394_v55 }
 0x21e   : > { %v2398_v58 = vadd.f32 %v2397_v57, %v7667_v56 }
 0x220   : > { %v2399_v59 = vsel %vm1944_vm2, %v2398_v58, -inf }
 0x221   : > { %2400 = vmax.xlane.f32.xlu0 %v2399_v59 }
 0x2aa   : > { %v2401_v60 = vpop.xlane.xlu0 %2400 }
 0x2ab   : > { %v2402_v61 = vsub.f32 %v2398_v58, %v2401_v60 }
 0x2ad   : > { %v2403_v62 = vmul.f32 1.442695, %v2402_v61 }
 0x2af   : > { %7062 = vpow2.f32 %v2403_v62 }
 0x2bc   : > { %v7063_v63 = vpop.eup %7062 }
 0x2bd   : > { %v2405_v1 = vsel %vm1944_vm2, %v7063_v63, 0.0 }
 0x2be   : > { %2406 = vadd.xlane.f32.xlu0 %v2405_v1 }
 0x347   : > { %v2407_v2 = vpop.xlane.xlu0 %2406 }
 0x348   : > { %7064 = vrcp.f32 %v2407_v2 }
 0x355   : > { %v7065_v6 = vpop.eup %7064 }
 0x356   : > { %v2409_v8 = vmul.f32 %v7065_v6, %v7063_v63 }
 0x358   : > { %v2411_v10 = vsel %vm1944_vm2, %v2409_v8, 0 }
 0x359   : > { %v2479_v11 = vand.u32 4294901760, %v2411_v10 }
 0x35b   : > { %v2480_v14 = vsub.f32 %v2411_v10, %v2479_v11  ;;  %6749 = vmatmul.mubr.f32.vlgmr.msra.gmra.mxu1 %v2479_v11 }
 0x35c   : > { %6757 = vmatpush3.msra.mxu1 %v7626_v23  ;;  %6758 = vmatprep.mubr.msk.f32.mxu1 %vm7138_vm0, %v7137_v0 }
 0x35d   : > { %6766 = vmatprep.subr.mxu1 %v7137_v0  ;;  %v2481_v16 = vand.u32 4294901760, %v2480_v14 }
 0x35f   : > { %6759 = vmatmul.mubr.f32.vlgmr.msra.gmra.mxu1 %v2481_v16  ;;  %v2482_v18 = vsub.f32 %v2480_v14, %v2481_v16 }
 0x360   : > { %6767 = vmatpush3.msra.mxu1 %v7626_v23  ;;  %6768 = vmatprep.mubr.msk.f32.mxu1 %vm7138_vm0, %v7137_v0  ;;  %v2936_v23 = vsub.f32 %v2934_v19, %v2935_v24 }
 0x361   : > { %6776 = vmatprep.subr.mxu1 %v7137_v0  ;;  %v2483_v21 = vand.u32 4294901760, %v2482_v18 }
 0x362   : > { %v2937_v25 = vand.u32 4294901760, %v2936_v23 }
 0x363   : > { %6744 = vmatmul.mubr.f32.vlgmr.msra.gmra.mxu0 %v2483_v21  ;;  %6769 = vmatmul.mubr.f32.vlgmr.msra.gmra.mxu1 %v2479_v11 }
 0x364   : > { %6752 = vmatpush3.msra.mxu0 %v7632_v27  ;;  %6777 = vmatpush3.xpose.msra.mxu1 %v2978_v22 }
 0x365   : > { %6753 = vmatprep.mubr.msk.f32.mxu0 %vm7138_vm0, %v7137_v0  ;;  %6761 = vmatprep.subr.mxu0 %v7137_v0 }
 0x366   : > { %6778 = vmatprep.mubr.msk.f32.mxu1 %vm7138_vm0, %v7137_v0  ;;  %6786 = vmatprep.subr.mxu1 %v7137_v0 }
 0x367   : > { %6754 = vmatmul.mubr.f32.vlgmr.msra.gmra.mxu0 %v2480_v14  ;;  %6779 = vmatmul.mubr.f32.vlgmr.msra.gmra.mxu1 %v2933_v15 }
 0x368   : > { %6762 = vmatpush3.msra.mxu0 %v2522_v31  ;;  %6787 = vmatpush3.xpose.msra.mxu1 %v2898_v5 }
 0x369   : > { %6763 = vmatprep.mubr.msk.f32.mxu0 %vm7138_vm0, %v7137_v0  ;;  %6771 = vmatprep.subr.mxu0 %v7137_v0 }
 0x36a   : > { %6788 = vmatprep.mubr.msk.f32.mxu1 %vm7138_vm0, %v7137_v0  ;;  %6796 = vmatprep.subr.mxu1 %v7137_v0 }
 0x36b   : > { %6764 = vmatmul.mubr.f32.vlgmr.msra.gmra.mxu0 %v2479_v11  ;;  %6789 = vmatmul.mubr.f32.vlgmr.msra.gmra.mxu1 %v2935_v24 }
 0x36c   : > { %6772 = vmatpush3.xpose.msra.mxu0 %v2898_v5  ;;  %6797 = vmatpush3.xpose.msra.mxu1 %v2898_v5 }
 0x36d   : > { %6773 = vmatprep.mubr.msk.f32.mxu0 %vm7138_vm0, %v7137_v0  ;;  %6781 = vmatprep.subr.mxu0 %v7137_v0 }
 0x36e   : > { %6798 = vmatprep.mubr.msk.f32.mxu1 %vm7138_vm0, %v7137_v0  ;;  %6806 = vmatprep.subr.mxu1 %v7137_v0 }
 0x36f   : > { %6774 = vmatmul.mubr.f32.vlgmr.msra.gmra.mxu0 %v2937_v25  ;;  %6799 = vmatmul.mubr.f32.vlgmr.msra.gmra.mxu1 %v2933_v15 }
 0x370   : > { %6782 = vmatpush3.xpose.msra.mxu0 %v2975_v7  ;;  %6783 = vmatprep.mubr.msk.f32.mxu0 %vm7138_vm0, %v7137_v0 }
 0x371   : > { %6791 = vmatprep.subr.mxu0 %v7137_v0  ;;  %6808 = vmatprep.mubr.msk.f32.mxu1 %vm7138_vm0, %v7137_v0 }
 0x373   : > { %6784 = vmatmul.mubr.f32.vlgmr.msra.gmra.mxu0 %v2934_v19 }
 0x374   : > { %6792 = vmatpush3.xpose.msra.mxu0 %v2976_v12  ;;  %6793 = vmatprep.mubr.msk.f32.mxu0 %vm7138_vm0, %v7137_v0 }
 0x375   : > { %6801 = vmatprep.subr.mxu0 %v7137_v0 }
 0x377   : > { %6794 = vmatmul.mubr.f32.vlgmr.msra.gmra.mxu0 %v2933_v15 }
 0x378   : > { %6803 = vmatprep.mubr.msk.f32.mxu0 %vm7138_vm0, %v7137_v0 }
 0x41b   : > { %v2561_v27 = vpop.f32.mrf.mxu1 }
 0x41d   : > { %v6750_v28 = vpop.f32.mrf.mxu1 }
 0x41f   : > { %v2709_v29 = vpop.f32.mrf.mxu1 }
 0x421   : > { %v6760_v30 = vpop.f32.mrf.mxu1 }
 0x423   : > { %v2485_v31 = vpop.f32.mrf.mxu0  ;;  %v2855_v32 = vpop.f32.mrf.mxu1 }
 0x424   : > { %v2562_v33 = vadd.f32 %v2561_v27, %v2485_v31 }
 0x425   : > { %v6745_v34 = vpop.f32.mrf.mxu0  ;;  %v6770_v35 = vpop.f32.mrf.mxu1 }
 0x427   : > { %v2635_v36 = vpop.f32.mrf.mxu0  ;;  %v3015_v37 = vpop.f32.mrf.mxu1 }
 0x428   : > { %v2636_v38 = vadd.f32 %v2635_v36, %v2562_v33 }
 0x429   : > { %v6755_v39 = vpop.f32.mrf.mxu0  ;;  %v6780_v40 = vpop.f32.mrf.mxu1 }
 0x42a   : > { %v2710_v41 = vadd.f32 %v2709_v29, %v2636_v38 }
 0x42b   : > { %v2783_v42 = vpop.f32.mrf.mxu0  ;;  %v3163_v43 = vpop.f32.mrf.mxu1 }
 0x42c   : > { %v2784_v44 = vadd.f32 %v2783_v42, %v2710_v41 }
 0x42d   : > { %v6765_v45 = vpop.f32.mrf.mxu0  ;;  %v6790_v46 = vpop.f32.mrf.mxu1 }
 0x42e   : > { %v7714_v47 = vadd.f32 %v2855_v32, %v2784_v44 }
 0x42f   : > { %v2939_v48 = vpop.f32.mrf.mxu0  ;;  %v3309_v49 = vpop.f32.mrf.mxu1 }
 0x430   : > { %v3016_v53 = vadd.f32 %v3015_v37, %v2939_v48 }
 0x431   : > { %v6775_v50 = vpop.f32.mrf.mxu0  ;;  %v6800_v52 = vpop.f32.mrf.mxu1 }
 0x433   : > { %v3089_v54 = vpop.f32.mrf.mxu0 }
 0x434   : > { %v3090_v55 = vadd.f32 %v3089_v54, %v3016_v53 }
 0x435   : > { %v6785_v57 = vpop.f32.mrf.mxu0 }
 0x436   : > { %v3164_v58 = vadd.f32 %v3163_v43, %v3090_v55 }
 0x437   : > { %v3237_v59 = vpop.f32.mrf.mxu0 }
 0x438   : > { %v3238_v60 = vadd.f32 %v3237_v59, %v3164_v58 }
 0x439   : > { %v6795_v61 = vpop.f32.mrf.mxu0 }
 0x43a   : > { %v3310_v62 = vadd.f32 %v3309_v49, %v3238_v60 }
 0x43c   : > { %v3313_v63 = vmul.f32 0.35355338, %v3310_v62 }
 0x43e   : > { %v3314_v1 = vadd.f32 %v3313_v63, %v7667_v56 }
 0x440   : > { %v3315_v2 = vsel %vm1944_vm2, %v3314_v1, -inf }
 0x441   : > { %3316 = vmax.xlane.f32.xlu0 %v3315_v2 }
 0x457   : > { %3327 = vrot.lane.b32.xlu0 %v7623_v20, %s7139_s29 }
 0x45b   : > { %3781 = vrot.lane.b32.xlu0 %v7608_v51, %s7140_s12 }
 0x45f   : > { %3779 = vrot.lane.b32.xlu0 %v7628_v26, %s7140_s12 }
 0x4ca   : > { %v3317_v3 = vpop.xlane.xlu0 %3316 }
 0x4cb   : > { %v3318_v4 = vsub.f32 %v3314_v1, %v3317_v3 }
 0x4cd   : > { %v3319_v5 = vmul.f32 1.442695, %v3318_v4 }
 0x4ce   : > { %v3328_v6 = vpop.permute.xlu0 %3327 }
 0x4cf   : > { %7066 = vpow2.f32 %v3319_v5  ;;  %v3364_v7 = vand.u32 4294901760, %v3328_v6 }
 0x4d1   : > { %v3441_v8 = vsub.f32 %v3328_v6, %v3364_v7  ;;  %6802 = vmatpush3.msra.mxu0 %v3364_v7 }
 0x4d2   : > { %6811 = vmatprep.subr.mxu0 %v7137_v0  ;;  %v3782_v15 = vpop.permute.xlu0 %3781 }
 0x4d3   : > { %v3442_v9 = vand.u32 4294901760, %v3441_v8  ;;  %v3785_v16 = vsel %vm1944_vm2, %v3782_v15, 0 }
 0x4d4   : > { %v3818_v17 = vand.u32 4294901760, %v3785_v16 }
 0x4d5   : > { %v3443_v10 = vsub.f32 %v3441_v8, %v3442_v9 }
 0x4d6   : > { %v7727_v19 = vsub.f32 %v3785_v16, %v3818_v17  ;;  %v3780_v22 = vpop.permute.xlu0 %3779 }
 0x4d7   : > { %v3444_v11 = vand.u32 4294901760, %v3443_v10  ;;  %v3783_v27 = vsel %vm1944_vm2, %v3780_v22, 0 }
 0x4d8   : > { %v3896_v25 = vand.u32 4294901760, %v7727_v19  ;;  %v3853_v30 = vand.u32 4294901760, %v3783_v27 }
 0x4d9   : > { %6807 = vmatpush3.msra.mxu1 %v3444_v11 }
 0x4da   : > { %6816 = vmatprep.subr.mxu1 %v7137_v0  ;;  %v3897_v32 = vsub.f32 %v7727_v19, %v3896_v25  ;;  %v3854_v35 = vsub.f32 %v3783_v27, %v3853_v30 }
 0x4dc   : > { %v7067_v12 = vpop.eup %7066  ;;  %v3898_v37 = vand.u32 4294901760, %v3897_v32  ;;  %v3855_v39 = vand.u32 4294901760, %v3854_v35 }
 0x4dd   : > { %v3321_v13 = vsel %vm1944_vm2, %v7067_v12, 0.0 }
 0x4de   : > { %3322 = vadd.xlane.f32.xlu1 %v3321_v13  ;;  %v3856_v41 = vsub.f32 %v3854_v35, %v3855_v39 }
 0x4e0   : > { %v3857_v43 = vand.u32 4294901760, %v3856_v41 }
 0x4ef   : > { %4246 = vrot.lane.b32.xlu1 %v7623_v20, %s7140_s12 }
 0x567   : > { %v3323_v14 = vpop.xlane.xlu1 %3322 }
 0x568   : > { %7068 = vrcp.f32 %v3323_v14 }
 0x56b   : > { %v4247_v28 = vpop.permute.xlu1 %4246 }
 0x56c   : > { %v7736_v33 = vand.u32 4294901760, %v4247_v28 }
 0x56e   : > { %v7742_v38 = vsub.f32 %v4247_v28, %v7736_v33 }
 0x570   : > { %v4361_v40 = vand.u32 4294901760, %v7742_v38 }
 0x572   : > { %v4362_v42 = vsub.f32 %v7742_v38, %v4361_v40 }
 0x574   : > { %v4363_v44 = vand.u32 4294901760, %v4362_v42 }
 0x575   : > { %v7069_v18 = vpop.eup %7068 }
 0x576   : > { %v3325_v21 = vmul.f32 %v7069_v18, %v7067_v12 }
 0x578   : > { %v3331_v24 = vsel %vm1944_vm2, %v3325_v21, 0 }
 0x579   : > { %v3399_v23 = vand.u32 4294901760, %v3331_v24 }
 0x57b   : > { %v3400_v29 = vsub.f32 %v3331_v24, %v3399_v23  ;;  %6809 = vmatmul.mubr.f32.vlgmr.msra.gmra.mxu1 %v3399_v23 }
 0x57c   : > { %6817 = vmatpush3.msra.mxu1 %v3364_v7  ;;  %6818 = vmatprep.mubr.msk.f32.mxu1 %vm7138_vm0, %v7137_v0 }
 0x57d   : > { %6826 = vmatprep.subr.mxu1 %v7137_v0  ;;  %v3401_v31 = vand.u32 4294901760, %v3400_v29 }
 0x57f   : > { %6819 = vmatmul.mubr.f32.vlgmr.msra.gmra.mxu1 %v3401_v31  ;;  %v3402_v34 = vsub.f32 %v3400_v29, %v3401_v31 }
 0x580   : > { %6827 = vmatpush3.msra.mxu1 %v3364_v7  ;;  %6828 = vmatprep.mubr.msk.f32.mxu1 %vm7138_vm0, %v7137_v0 }
 0x581   : > { %6836 = vmatprep.subr.mxu1 %v7137_v0  ;;  %v3403_v36 = vand.u32 4294901760, %v3402_v34 }
 0x583   : > { %6804 = vmatmul.mubr.f32.vlgmr.msra.gmra.mxu0 %v3403_v36  ;;  %6829 = vmatmul.mubr.f32.vlgmr.msra.gmra.mxu1 %v3399_v23 }
 0x584   : > { %6812 = vmatpush3.msra.mxu0 %v3441_v8  ;;  %6837 = vmatpush3.xpose.msra.mxu1 %v3898_v37 }
 0x585   : > { %6813 = vmatprep.mubr.msk.f32.mxu0 %vm7138_vm0, %v7137_v0  ;;  %6821 = vmatprep.subr.mxu0 %v7137_v0 }
 0x586   : > { %6838 = vmatprep.mubr.msk.f32.mxu1 %vm7138_vm0, %v7137_v0  ;;  %6846 = vmatprep.subr.mxu1 %v7137_v0 }
 0x587   : > { %6814 = vmatmul.mubr.f32.vlgmr.msra.gmra.mxu0 %v3400_v29  ;;  %6839 = vmatmul.mubr.f32.vlgmr.msra.gmra.mxu1 %v3853_v30 }
 0x588   : > { %6822 = vmatpush3.msra.mxu0 %v3442_v9  ;;  %6847 = vmatpush3.xpose.msra.mxu1 %v3818_v17 }
 0x589   : > { %6823 = vmatprep.mubr.msk.f32.mxu0 %vm7138_vm0, %v7137_v0  ;;  %6831 = vmatprep.subr.mxu0 %v7137_v0 }
 0x58a   : > { %6848 = vmatprep.mubr.msk.f32.mxu1 %vm7138_vm0, %v7137_v0  ;;  %6856 = vmatprep.subr.mxu1 %v7137_v0 }
 0x58b   : > { %6824 = vmatmul.mubr.f32.vlgmr.msra.gmra.mxu0 %v3399_v23  ;;  %6849 = vmatmul.mubr.f32.vlgmr.msra.gmra.mxu1 %v3855_v39 }
 0x58c   : > { %6832 = vmatpush3.xpose.msra.mxu0 %v3818_v17  ;;  %6857 = vmatpush3.xpose.msra.mxu1 %v3818_v17 }
 0x58d   : > { %6833 = vmatprep.mubr.msk.f32.mxu0 %vm7138_vm0, %v7137_v0  ;;  %6841 = vmatprep.subr.mxu0 %v7137_v0 }
 0x58e   : > { %6858 = vmatprep.mubr.msk.f32.mxu1 %vm7138_vm0, %v7137_v0  ;;  %6866 = vmatprep.subr.mxu1 %v7137_v0 }
 0x58f   : > { %6834 = vmatmul.mubr.f32.vlgmr.msra.gmra.mxu0 %v3857_v43  ;;  %6859 = vmatmul.mubr.f32.vlgmr.msra.gmra.mxu1 %v3853_v30 }
 0x590   : > { %6842 = vmatpush3.xpose.msra.mxu0 %v7727_v19  ;;  %6867 = vmatpush3.msra.mxu1 %v4363_v44 }
 0x591   : > { %6843 = vmatprep.mubr.msk.f32.mxu0 %vm7138_vm0, %v7137_v0  ;;  %6851 = vmatprep.subr.mxu0 %v7137_v0 }
 0x592   : > { %6868 = vmatprep.mubr.msk.f32.mxu1 %vm7138_vm0, %v7137_v0  ;;  %6876 = vmatprep.subr.mxu1 %v7137_v0 }
 0x593   : > { %6844 = vmatmul.mubr.f32.vlgmr.msra.gmra.mxu0 %v3854_v35 }
 0x594   : > { %6852 = vmatpush3.xpose.msra.mxu0 %v3896_v25  ;;  %6853 = vmatprep.mubr.msk.f32.mxu0 %vm7138_vm0, %v7137_v0 }
 0x595   : > { %6861 = vmatprep.subr.mxu0 %v7137_v0 }
 0x597   : > { %6854 = vmatmul.mubr.f32.vlgmr.msra.gmra.mxu0 %v3853_v30 }
 0x598   : > { %6862 = vmatpush3.msra.mxu0 %v7736_v33  ;;  %6863 = vmatprep.mubr.msk.f32.mxu0 %vm7138_vm0, %v7137_v0 }
 0x599   : > { %6871 = vmatprep.subr.mxu0 %v7137_v0 }
 0x63b   : > { %v3481_v45 = vpop.f32.mrf.mxu1 }
 0x63d   : > { %v6810_v46 = vpop.f32.mrf.mxu1 }
 0x63f   : > { %v3629_v48 = vpop.f32.mrf.mxu1 }
 0x641   : > { %v6820_v49 = vpop.f32.mrf.mxu1 }
 0x643   : > { %v3405_v50 = vpop.f32.mrf.mxu0  ;;  %v3775_v52 = vpop.f32.mrf.mxu1 }
 0x644   : > { %v3482_v53 = vadd.f32 %v3481_v45, %v3405_v50 }
 0x645   : > { %v6805_v54 = vpop.f32.mrf.mxu0  ;;  %v6830_v55 = vpop.f32.mrf.mxu1 }
 0x647   : > { %v3555_v57 = vpop.f32.mrf.mxu0  ;;  %v3935_v58 = vpop.f32.mrf.mxu1 }
 0x648   : > { %v3556_v59 = vadd.f32 %v3555_v57, %v3482_v53 }
 0x649   : > { %v6815_v60 = vpop.f32.mrf.mxu0  ;;  %v6840_v61 = vpop.f32.mrf.mxu1 }
 0x64a   : > { %v3630_v62 = vadd.f32 %v3629_v48, %v3556_v59 }
 0x64b   : > { %v3703_v63 = vpop.f32.mrf.mxu0  ;;  %v4083_v1 = vpop.f32.mrf.mxu1 }
 0x64c   : > { %v3704_v2 = vadd.f32 %v3703_v63, %v3630_v62 }
 0x64d   : > { %v6825_v3 = vpop.f32.mrf.mxu0  ;;  %v6850_v4 = vpop.f32.mrf.mxu1 }
 0x64e   : > { %v7780_v5 = vadd.f32 %v3775_v52, %v3704_v2 }
 0x64f   : > { %v3859_v6 = vpop.f32.mrf.mxu0  ;;  %v4229_v7 = vpop.f32.mrf.mxu1 }
 0x650   : > { %v3936_v10 = vadd.f32 %v3935_v58, %v3859_v6 }
 0x651   : > { %v6835_v8 = vpop.f32.mrf.mxu0  ;;  %v6860_v9 = vpop.f32.mrf.mxu1 }
 0x653   : > { %v4009_v11 = vpop.f32.mrf.mxu0 }
 0x654   : > { %v4010_v12 = vadd.f32 %v4009_v11, %v3936_v10 }
 0x655   : > { %v6845_v13 = vpop.f32.mrf.mxu0 }
 0x656   : > { %v4084_v14 = vadd.f32 %v4083_v1, %v4010_v12 }
 0x657   : > { %v4157_v15 = vpop.f32.mrf.mxu0 }
 0x658   : > { %v4158_v16 = vadd.f32 %v4157_v15, %v4084_v14 }
 0x659   : > { %v6855_v17 = vpop.f32.mrf.mxu0 }
 0x65a   : > { %v4230_v18 = vadd.f32 %v4229_v7, %v4158_v16 }
 0x65c   : > { %v4233_v19 = vmul.f32 0.35355338, %v4230_v18 }
 0x65e   : > { %v4234_v21 = vadd.f32 %v4233_v19, %v7667_v56 }
 0x660   : > { %v4235_v22 = vsel %vm1944_vm2, %v4234_v21, -inf }
 0x661   : > { %4236 = vmax.xlane.f32.xlu0 %v4235_v22 }
 0x6ea   : > { %v4237_v24 = vpop.xlane.xlu0 %4236 }
 0x6eb   : > { %v4238_v23 = vsub.f32 %v4234_v21, %v4237_v24 }
 0x6ed   : > { %v4239_v25 = vmul.f32 1.442695, %v4238_v23 }
 0x6ef   : > { %7070 = vpow2.f32 %v4239_v25 }
 0x6fc   : > { %v7071_v27 = vpop.eup %7070 }
 0x6fd   : > { %v4241_v28 = vsel %vm1944_vm2, %v7071_v27, 0.0 }
 0x6fe   : > { %4242 = vadd.xlane.f32.xlu1 %v4241_v28 }
 0x70f   : > { %4700 = vrot.lane.b32.xlu1 %v7608_v51, %s7141_s16 }
 0x713   : > { %4698 = vrot.lane.b32.xlu1 %v7628_v26, %s7141_s16 }
 0x787   : > { %v4243_v29 = vpop.xlane.xlu1 %4242 }
 0x788   : > { %7072 = vrcp.f32 %v4243_v29 }
 0x78b   : > { %v4701_v30 = vpop.permute.xlu1 %4700 }
 0x78c   : > { %v4704_v31 = vsel %vm1944_vm2, %v4701_v30, 0 }
 0x78d   : > { %v4737_v32 = vand.u32 4294901760, %v4704_v31 }
 0x78f   : > { %v4814_v35 = vsub.f32 %v4704_v31, %v4737_v32  ;;  %v4699_v37 = vpop.permute.xlu1 %4698 }
 0x790   : > { %v4702_v43 = vsel %vm1944_vm2, %v4699_v37, 0 }
 0x791   : > { %v4815_v42 = vand.u32 4294901760, %v4814_v35  ;;  %v4772_v26 = vand.u32 4294901760, %v4702_v43 }
 0x793   : > { %v4816_v45 = vsub.f32 %v4814_v35, %v4815_v42  ;;  %v4773_v48 = vsub.f32 %v4702_v43, %v4772_v26 }
 0x795   : > { %v7073_v34 = vpop.eup %7072  ;;  %v4817_v50 = vand.u32 4294901760, %v4816_v45  ;;  %v4774_v52 = vand.u32 4294901760, %v4773_v48 }
 0x796   : > { %v4245_v36 = vmul.f32 %v7073_v34, %v7071_v27 }
 0x798   : > { %v4250_v39 = vsel %vm1944_vm2, %v4245_v36, 0 }
 0x799   : > { %v4318_v41 = vand.u32 4294901760, %v4250_v39 }
 0x79b   : > { %v4319_v51 = vsub.f32 %v4250_v39, %v4318_v41  ;;  %6869 = vmatmul.mubr.f32.vlgmr.msra.gmra.mxu1 %v4318_v41 }
 0x79c   : > { %6877 = vmatpush3.msra.mxu1 %v7736_v33  ;;  %6878 = vmatprep.mubr.msk.f32.mxu1 %vm7138_vm0, %v7137_v0 }
 0x79d   : > { %6886 = vmatprep.subr.mxu1 %v7137_v0  ;;  %v4320_v44 = vand.u32 4294901760, %v4319_v51 }
 0x79f   : > { %6879 = vmatmul.mubr.f32.vlgmr.msra.gmra.mxu1 %v4320_v44  ;;  %v4321_v46 = vsub.f32 %v4319_v51, %v4320_v44 }
 0x7a0   : > { %6887 = vmatpush3.msra.mxu1 %v7736_v33  ;;  %6888 = vmatprep.mubr.msk.f32.mxu1 %vm7138_vm0, %v7137_v0  ;;  %v4775_v33 = vsub.f32 %v4773_v48, %v4774_v52 }
 0x7a1   : > { %6896 = vmatprep.subr.mxu1 %v7137_v0  ;;  %v4322_v49 = vand.u32 4294901760, %v4321_v46 }
 0x7a2   : > { %v4776_v53 = vand.u32 4294901760, %v4775_v33 }
 0x7a3   : > { %6864 = vmatmul.mubr.f32.vlgmr.msra.gmra.mxu0 %v4322_v49  ;;  %6889 = vmatmul.mubr.f32.vlgmr.msra.gmra.mxu1 %v4318_v41  ;;  %v5637_v49 = vld [vmem:[#allocation4 + $0x18] sm:$0xff] }
 0x7a4   : > { %6872 = vmatpush3.msra.mxu0 %v7742_v38  ;;  %6897 = vmatpush3.xpose.msra.mxu1 %v4817_v50  ;;  %v5636_v50 = vld [vmem:[#allocation4 + $0x10] sm:$0xff] }
 0x7a5   : > { %6873 = vmatprep.mubr.msk.f32.mxu0 %vm7138_vm0, %v7137_v0  ;;  %6881 = vmatprep.subr.mxu0 %v7137_v0  ;;  %v7858_v33 = vand.u32 4294901760, %v5636_v50 }
 0x7a6   : > { %6898 = vmatprep.mubr.msk.f32.mxu1 %vm7138_vm0, %v7137_v0  ;;  %6906 = vmatprep.subr.mxu1 %v7137_v0 }
 0x7a7   : > { %6874 = vmatmul.mubr.f32.vlgmr.msra.gmra.mxu0 %v4319_v51  ;;  %6899 = vmatmul.mubr.f32.vlgmr.msra.gmra.mxu1 %v4772_v26 }
 0x7a8   : > { %6882 = vmatpush3.msra.mxu0 %v4361_v40  ;;  %6907 = vmatpush3.xpose.msra.mxu1 %v4737_v32 }
 0x7a9   : > { %6883 = vmatprep.mubr.msk.f32.mxu0 %vm7138_vm0, %v7137_v0  ;;  %6891 = vmatprep.subr.mxu0 %v7137_v0 }
 0x7aa   : > { %6908 = vmatprep.mubr.msk.f32.mxu1 %vm7138_vm0, %v7137_v0  ;;  %6916 = vmatprep.subr.mxu1 %v7137_v0 }
 0x7ab   : > { %6884 = vmatmul.mubr.f32.vlgmr.msra.gmra.mxu0 %v4318_v41  ;;  %6909 = vmatmul.mubr.f32.vlgmr.msra.gmra.mxu1 %v4774_v52  ;;  %v7856_v52 = vand.u32 4294901760, %v5637_v49 }
 0x7ac   : > { %6892 = vmatpush3.xpose.msra.mxu0 %v4737_v32  ;;  %6917 = vmatpush3.xpose.msra.mxu1 %v4737_v32 }
 0x7ad   : > { %6893 = vmatprep.mubr.msk.f32.mxu0 %vm7138_vm0, %v7137_v0  ;;  %6901 = vmatprep.subr.mxu0 %v7137_v0 }
 0x7ae   : > { %6918 = vmatprep.mubr.msk.f32.mxu1 %vm7138_vm0, %v7137_v0  ;;  %6926 = vmatprep.subr.mxu1 %v7137_v0 }
 0x7af   : > { %6894 = vmatmul.mubr.f32.vlgmr.msra.gmra.mxu0 %v4776_v53  ;;  %6919 = vmatmul.mubr.f32.vlgmr.msra.gmra.mxu1 %v4772_v26  ;;  %v7861_v53 = vsub.f32 %v5637_v49, %v7856_v52 }
 0x7b0   : > { %6902 = vmatpush3.xpose.msra.mxu0 %v4814_v35  ;;  %6903 = vmatprep.mubr.msk.f32.mxu0 %vm7138_vm0, %v7137_v0 }
 0x7b1   : > { %6911 = vmatprep.subr.mxu0 %v7137_v0  ;;  %6928 = vmatprep.mubr.msk.f32.mxu1 %vm7138_vm0, %v7137_v0 }
 0x7b3   : > { %6904 = vmatmul.mubr.f32.vlgmr.msra.gmra.mxu0 %v4773_v48 }
 0x7b4   : > { %6912 = vmatpush3.xpose.msra.mxu0 %v4815_v42  ;;  %6913 = vmatprep.mubr.msk.f32.mxu0 %vm7138_vm0, %v7137_v0 }
 0x7b5   : > { %6921 = vmatprep.subr.mxu0 %v7137_v0 }
 0x7b7   : > { %6914 = vmatmul.mubr.f32.vlgmr.msra.gmra.mxu0 %v4772_v26 }
 0x7b8   : > { %6923 = vmatprep.mubr.msk.f32.mxu0 %vm7138_vm0, %v7137_v0 }
 0x85b   : > { %v4400_v38 = vpop.f32.mrf.mxu1 }
 0x85d   : > { %v6870_v40 = vpop.f32.mrf.mxu1 }
 0x85e   : > { %v5747_v40 = vand.u32 4294901760, %v7861_v53 }
 0x85f   : > { %v4548_v54 = vpop.f32.mrf.mxu1 }
 0x861   : > { %v6880_v55 = vpop.f32.mrf.mxu1 }
 0x862   : > { %v5748_v55 = vsub.f32 %v7861_v53, %v5747_v40 }
 0x863   : > { %v4324_v57 = vpop.f32.mrf.mxu0  ;;  %v4694_v58 = vpop.f32.mrf.mxu1 }
 0x864   : > { %v4401_v23 = vadd.f32 %v4400_v38, %v4324_v57  ;;  %v7864_v38 = vsub.f32 %v5636_v50, %v7858_v33 }
 0x865   : > { %v6865_v59 = vpop.f32.mrf.mxu0  ;;  %v6890_v60 = vpop.f32.mrf.mxu1 }
 0x866   : > { %v5635_v60 = vld [vmem:[#allocation4 + $0x8] sm:$0xff] }
 0x867   : > { %v4474_v61 = vpop.f32.mrf.mxu0  ;;  %v4854_v62 = vpop.f32.mrf.mxu1 }
 0x868   : > { %v4475_v25 = vadd.f32 %v4474_v61, %v4401_v23  ;;  %v7880_v61 = vand.u32 4294901760, %v5635_v60 }
 0x869   : > { %v6875_v63 = vpop.f32.mrf.mxu0  ;;  %v6900_v1 = vpop.f32.mrf.mxu1 }
 0x86a   : > { %v4549_v27 = vadd.f32 %v4548_v54, %v4475_v25  ;;  %v5754_v54 = vand.u32 4294901760, %v7864_v38  ;;  %v5634_v63 = vld [vmem:[#allocation4] sm:$0xff]  ;;  %v7883_v1 = vsub.f32 %v5635_v60, %v7880_v61 }
 0x86b   : > { %v4622_v2 = vpop.f32.mrf.mxu0  ;;  %v5002_v3 = vpop.f32.mrf.mxu1 }
 0x86c   : > { %v4623_v28 = vadd.f32 %v4622_v2, %v4549_v27  ;;  %v5755_v57 = vsub.f32 %v7864_v38, %v5754_v54  ;;  %v7885_v2 = vand.u32 4294901760, %v5634_v63 }
 0x86d   : > { %v6885_v4 = vpop.f32.mrf.mxu0  ;;  %v6910_v6 = vpop.f32.mrf.mxu1 }
 0x86e   : > { %v4695_v29 = vadd.f32 %v4694_v58, %v4623_v28  ;;  %v5749_v58 = vand.u32 4294901760, %v5748_v55  ;;  %v5756_v59 = vand.u32 4294901760, %v5755_v57  ;;  %v5761_v4 = vand.u32 4294901760, %v7883_v1 }
 0x86f   : > { %v4778_v7 = vpop.f32.mrf.mxu0  ;;  %v5148_v8 = vpop.f32.mrf.mxu1  ;;  %v7891_v6 = vsub.f32 %v5634_v63, %v7885_v2 }
 0x870   : > { %v4855_v11 = vadd.f32 %v4854_v62, %v4778_v7 }
 0x871   : > { %v6895_v9 = vpop.f32.mrf.mxu0  ;;  %v6920_v10 = vpop.f32.mrf.mxu1 }
 0x872   : > { %v5768_v9 = vand.u32 4294901760, %v7891_v6 }
 0x873   : > { %v4928_v12 = vpop.f32.mrf.mxu0 }
 0x874   : > { %v4929_v13 = vadd.f32 %v4928_v12, %v4855_v11  ;;  %v5769_v12 = vsub.f32 %v7891_v6, %v5768_v9 }
 0x875   : > { %v6905_v14 = vpop.f32.mrf.mxu0 }
 0x876   : > { %v5003_v15 = vadd.f32 %v5002_v3, %v4929_v13 }
 0x877   : > { %v5076_v16 = vpop.f32.mrf.mxu0 }
 0x878   : > { %v5077_v17 = vadd.f32 %v5076_v16, %v5003_v15  ;;  %v5770_v15 = vand.u32 4294901760, %v5769_v12 }
 0x879   : > { %v6915_v18 = vpop.f32.mrf.mxu0 }
 0x87a   : > { %v5149_v19 = vadd.f32 %v5148_v8, %v5077_v17  ;;  %v5762_v8 = vsub.f32 %v7883_v1, %v5761_v4 }
 0x87c   : > { %v5152_v21 = vmul.f32 0.35355338, %v5149_v19  ;;  %v5763_v11 = vand.u32 4294901760, %v5762_v8 }
 0x87e   : > { %v5153_v22 = vadd.f32 %v5152_v21, %v7667_v56 }
 0x880   : > { %v5154_v24 = vsel %vm1944_vm2, %v5153_v22, -inf }
 0x881   : > { %5155 = vmax.xlane.f32.xlu0 %v5154_v24 }
 0x897   : > { %5165 = vrot.lane.b32.xlu0 %v7623_v20, %s7141_s16 }
 0x89b   : > { %5618 = vrot.lane.b32.xlu0 %v7780_v5, %s7142_s18 }
 0x89f   : > { %5622 = vrot.lane.b32.xlu0 %v4695_v29, %s7143_s19 }
 0x90a   : > { %v5156_v30 = vpop.xlane.xlu0 %5155 }
 0x90b   : > { %v5157_v31 = vsub.f32 %v5153_v22, %v5156_v30 }
 0x90d   : > { %v5158_v32 = vmul.f32 1.442695, %v5157_v31 }
 0x90e   : > { %v5166_v56 = vpop.permute.xlu0 %5165 }
 0x90f   : > { %7074 = vpow2.f32 %v5158_v32  ;;  %v5202_v34 = vand.u32 4294901760, %v5166_v56 }
 0x911   : > { %v5279_v35 = vsub.f32 %v5166_v56, %v5202_v34  ;;  %6922 = vmatpush3.msra.mxu0 %v5202_v34 }
 0x912   : > { %6931 = vmatprep.subr.mxu0 %v7137_v0  ;;  %v5619_v29 = vpop.permute.xlu0 %5618 }
 0x913   : > { %v5280_v36 = vand.u32 4294901760, %v5279_v35  ;;  %v5629_v31 = vsel %vm1944_vm2, %v7714_v47, %v5619_v29 }
 0x915   : > { %v5281_v37 = vsub.f32 %v5279_v35, %v5280_v36 }
 0x916   : > { %v5623_v30 = vpop.permute.xlu0 %5622 }
 0x917   : > { %v5282_v20 = vand.u32 4294901760, %v5281_v37  ;;  %v5631_v32 = vsel %vm5630_vm3, %v5629_v31, %v5623_v30 }
 0x919   : > { %6927 = vmatpush3.msra.mxu1 %v5282_v20 }
 0x91a   : > { %6936 = vmatprep.subr.mxu1 %v7137_v0 }
 0x91c   : > { %v7075_v5 = vpop.eup %7074 }
 0x91d   : > { %v5160_v39 = vsel %vm1944_vm2, %v7075_v5, 0.0 }
 0x91e   : > { %5161 = vadd.xlane.f32.xlu1 %v5160_v39 }
 0x9a7   : > { %v5162_v41 = vpop.xlane.xlu1 %5161 }
 0x9a8   : > { %7076 = vrcp.f32 %v5162_v41 }
 0x9b5   : > { %v7077_v42 = vpop.eup %7076 }
 0x9b6   : > { %v5164_v43 = vmul.f32 %v7077_v42, %v7075_v5 }
 0x9b8   : > { %v5169_v51 = vsel %vm1944_vm2, %v5164_v43, 0 }
 0x9b9   : > { %v5237_v26 = vand.u32 4294901760, %v5169_v51 }
 0x9bb   : > { %v5238_v44 = vsub.f32 %v5169_v51, %v5237_v26  ;;  %6929 = vmatmul.mubr.f32.vlgmr.msra.gmra.mxu1 %v5237_v26 }
 0x9bc   : > { %6937 = vmatpush3.msra.mxu1 %v5202_v34  ;;  %6938 = vmatprep.mubr.msk.f32.mxu1 %vm7138_vm0, %v7137_v0 }
 0x9bd   : > { %6946 = vmatprep.subr.mxu1 %v7137_v0  ;;  %v5239_v45 = vand.u32 4294901760, %v5238_v44 }
 0x9bf   : > { %6939 = vmatmul.mubr.f32.vlgmr.msra.gmra.mxu1 %v5239_v45  ;;  %v5240_v46 = vsub.f32 %v5238_v44, %v5239_v45 }
 0x9c0   : > { %6947 = vmatpush3.msra.mxu1 %v5202_v34  ;;  %6948 = vmatprep.mubr.msk.f32.mxu1 %vm7138_vm0, %v7137_v0 }
 0x9c1   : > { %v5241_v48 = vand.u32 4294901760, %v5240_v46  ;;  %6962 = vmatprep.subr.mxu1 %v7137_v0 }
 0x9c3   : > { %6924 = vmatmul.mubr.f32.vlgmr.msra.gmra.mxu0 %v5241_v48  ;;  %6949 = vmatmul.mubr.f32.vlgmr.msra.gmra.mxu1 %v5237_v26 }
 0x9c4   : > { %6932 = vmatpush3.msra.mxu0 %v5279_v35  ;;  %6933 = vmatprep.mubr.msk.f32.mxu0 %vm7138_vm0, %v7137_v0 }
 0x9c5   : > { %6941 = vmatprep.subr.mxu0 %v7137_v0  ;;  %6970 = vmatprep.mubr.msk.f32.mxu1 %vm7138_vm0, %v7137_v0 }
 0x9c6   : > { %6963 = vmatpush3.msra.mxu1 %v5749_v58 }
 0x9c7   : > { %6934 = vmatmul.mubr.f32.vlgmr.msra.gmra.mxu0 %v5238_v44  ;;  %6964 = vmatprep.subr.mxu1 %v7137_v0 }
 0x9c8   : > { %6942 = vmatpush3.msra.mxu0 %v5280_v36  ;;  %6943 = vmatprep.mubr.msk.f32.mxu0 %vm7138_vm0, %v7137_v0 }
 0x9c9   : > { %6951 = vmatprep.subr.mxu0 %v7137_v0  ;;  %6965 = vmatpush3.msra.mxu1 %v5756_v59 }
 0x9ca   : > { %6966 = vmatprep.subr.mxu1 %v7137_v0 }
 0x9cb   : > { %6944 = vmatmul.mubr.f32.vlgmr.msra.gmra.mxu0 %v5237_v26  ;;  %6967 = vmatpush3.msra.mxu1 %v5763_v11 }
 0x9cc   : > { %6959 = vmatprep.mubr.msk.f32.mxu0 %vm7138_vm0, %v7137_v0  ;;  %6952 = vmatpush3.msra.mxu0 %v7856_v52 }
 0x9cd   : > { %6953 = vmatprep.subr.mxu0 %v7137_v0  ;;  %6968 = vmatprep.subr.mxu1 %v7137_v0 }
 0x9ce   : > { %6954 = vmatpush3.msra.mxu0 %v7858_v33  ;;  %6969 = vmatpush3.msra.mxu1 %v5770_v15 }
 0x9cf   : > { %6955 = vmatprep.subr.mxu0 %v7137_v0  ;;  %6984 = vmatprep.subr.mxu1 %v7137_v0 }
 0x9d0   : > { %6956 = vmatpush3.msra.mxu0 %v7880_v61 }
 0x9d1   : > { %6957 = vmatprep.subr.mxu0 %v7137_v0 }
 0x9d2   : > { %6958 = vmatpush3.msra.mxu0 %v7885_v2 }
 0x9d3   : > { %6973 = vmatprep.subr.mxu0 %v7137_v0 }
 0xa7b   : > { %v5319_v62 = vpop.f32.mrf.mxu1 }
 0xa7d   : > { %v6930_v3 = vpop.f32.mrf.mxu1 }
 0xa7e   : > { %v6294_v3 = vld [vmem:[%s7979_s8] ss:$0 sm:$0xff] }
 0xa7f   : > { %v5467_v7 = vpop.f32.mrf.mxu1 }
 0xa81   : > { %v6940_v10 = vpop.f32.mrf.mxu1 }
 0xa83   : > { %v5243_v13 = vpop.f32.mrf.mxu0  ;;  %v5613_v14 = vpop.f32.mrf.mxu1 }
 0xa84   : > { %v5320_v18 = vadd.f32 %v5319_v62, %v5243_v13 }
 0xa85   : > { %v6925_v16 = vpop.f32.mrf.mxu0  ;;  %v6950_v17 = vpop.f32.mrf.mxu1 }
 0xa87   : > { %v5393_v19 = vpop.f32.mrf.mxu0 }
 0xa88   : > { %v5394_v21 = vadd.f32 %v5393_v19, %v5320_v18 }
 0xa89   : > { %v6935_v22 = vpop.f32.mrf.mxu0 }
 0xa8a   : > { %v5468_v24 = vadd.f32 %v5467_v7, %v5394_v21 }
 0xa8b   : > { %v5541_v23 = vpop.f32.mrf.mxu0 }
 0xa8c   : > { %v5542_v25 = vadd.f32 %v5541_v23, %v5468_v24 }
 0xa8d   : > { %v6945_v27 = vpop.f32.mrf.mxu0 }
 0xa8e   : > { %v5614_v28 = vadd.f32 %v5613_v14, %v5542_v25 }
 0xa90   : > { %5626 = vrot.lane.b32.xlu0 %v5614_v28, %s7144_s20 }
 0xb02   : > { %v5627_v56 = vpop.permute.xlu0 %5626 }
 0xb03   : > { %v5633_v34 = vsel %vm5632_vm4, %v5631_v32, %v5627_v56 }
 0xb04   : > { %v5639_v35 = vsel %vm464_vm1, %v5633_v34, 0 }
 0xb05   : > { %v5710_v36 = vand.u32 4294901760, %v5639_v35 }
 0xb07   : > { %v5711_v37 = vsub.f32 %v5639_v35, %v5710_v36  ;;  %6971 = vmatmul.mubr.f32.vlgmr.msra.gmra.mxu1 %v5710_v36 }
 0xb08   : > { %6985 = vmatpush3.msra.mxu1 %v7856_v52  ;;  %6992 = vmatprep.mubr.msk.f32.mxu1 %vm7138_vm0, %v7137_v0 }
 0xb09   : > { %6986 = vmatprep.subr.mxu1 %v7137_v0  ;;  %v5712_v20 = vand.u32 4294901760, %v5711_v37 }
 0xb0a   : > { %6987 = vmatpush3.msra.mxu1 %v7858_v33 }
 0xb0b   : > { %6988 = vmatprep.subr.mxu1 %v7137_v0  ;;  %v5713_v47 = vsub.f32 %v5711_v37, %v5712_v20 }
 0xb0c   : > { %6989 = vmatpush3.msra.mxu1 %v7880_v61 }
 0xb0d   : > { %6990 = vmatprep.subr.mxu1 %v7137_v0  ;;  %v5714_v5 = vand.u32 4294901760, %v5713_v47 }
 0xb0e   : > { %6991 = vmatpush3.msra.mxu1 %v7885_v2 }
 0xb0f   : > { %6993 = vmatmul.mubr.f32.vlgmr.msra.gmra.mxu1 %v5712_v20  ;;  %7006 = vmatprep.subr.mxu1 %v7137_v0 }
 0xb10   : > { %6960 = vmatmul.mubr.f32.vlgmr.msra.gmra.mxu0 %v5714_v5  ;;  %7007 = vmatpush3.msra.mxu1 %v7856_v52 }
 0xb11   : > { %6974 = vmatpush3.msra.mxu0 %v7861_v53  ;;  %7008 = vmatprep.subr.mxu1 %v7137_v0 }
 0xb12   : > { %6975 = vmatprep.subr.mxu0 %v7137_v0  ;;  %7009 = vmatpush3.msra.mxu1 %v7858_v33 }
 0xb13   : > { %6976 = vmatpush3.msra.mxu0 %v7864_v38  ;;  %7010 = vmatprep.subr.mxu1 %v7137_v0 }
 0xb14   : > { %6977 = vmatprep.subr.mxu0 %v7137_v0  ;;  %7011 = vmatpush3.msra.mxu1 %v7880_v61 }
 0xb15   : > { %6978 = vmatpush3.msra.mxu0 %v7883_v1  ;;  %7012 = vmatprep.subr.mxu1 %v7137_v0  ;;  %v6293_v1 = vld [vmem:[%s7978_s7] ss:$0 sm:$0xff] }
 0xb16   : > { %6979 = vmatprep.subr.mxu0 %v7137_v0  ;;  %6981 = vmatprep.mubr.msk.f32.mxu0 %vm7138_vm0, %v7137_v0 }
 0xb17   : > { %6980 = vmatpush3.msra.mxu0 %v7891_v6  ;;  %7013 = vmatpush3.msra.mxu1 %v7885_v2 }
 0xb18   : > { %7014 = vmatprep.mubr.msk.f32.mxu1 %vm7138_vm0, %v7137_v0  ;;  %6982 = vmatmul.mubr.f32.vlgmr.msra.gmra.mxu0 %v5711_v37 }
 0xb19   : > { %6995 = vmatprep.subr.mxu0 %v7137_v0  ;;  %7015 = vmatmul.mubr.f32.vlgmr.msra.gmra.mxu1 %v5710_v36 }
 0xb1a   : > { %6996 = vmatpush3.msra.mxu0 %v5747_v40  ;;  %7003 = vmatprep.mubr.msk.f32.mxu0 %vm7138_vm0, %v7137_v0 }
 0xb1b   : > { %6997 = vmatprep.subr.mxu0 %v7137_v0 }
 0xb1c   : > { %6998 = vmatpush3.msra.mxu0 %v5754_v54 }
 0xb1d   : > { %6999 = vmatprep.subr.mxu0 %v7137_v0 }
 0xb1e   : > { %7000 = vmatpush3.msra.mxu0 %v5761_v4 }
 0xb1f   : > { %7001 = vmatprep.subr.mxu0 %v7137_v0 }
 0xb20   : > { %7002 = vmatpush3.msra.mxu0 %v5768_v9 }
 0xb21   : > { %7004 = vmatmul.mubr.f32.vlgmr.msra.gmra.mxu0 %v5710_v36 }
 0xbc7   : > { %v5807_v39 = vpop.f32.mrf.mxu1 }
 0xbc9   : > { %v6972_v41 = vpop.f32.mrf.mxu1 }
 0xbcf   : > { %v5964_v42 = vpop.f32.mrf.mxu1 }
 0xbd0   : > { %v5716_v43 = vpop.f32.mrf.mxu0 }
 0xbd1   : > { %v6994_v51 = vpop.f32.mrf.mxu1  ;;  %v5808_v46 = vadd.f32 %v5807_v39, %v5716_v43 }
 0xbd2   : > { %v6961_v26 = vpop.f32.mrf.mxu0 }
 0xbd8   : > { %v5887_v44 = vpop.f32.mrf.mxu0 }
 0xbd9   : > { %v6122_v45 = vpop.f32.mrf.mxu1  ;;  %v5888_v50 = vadd.f32 %v5887_v44, %v5808_v46 }
 0xbda   : > { %v6983_v48 = vpop.f32.mrf.mxu0 }
 0xbdb   : > { %v7016_v49 = vpop.f32.mrf.mxu1  ;;  %v5965_v52 = vadd.f32 %v5964_v42, %v5888_v50 }
 0xbe1   : > { %v6047_v33 = vpop.f32.mrf.mxu0 }
 0xbe2   : > { %v6048_v53 = vadd.f32 %v6047_v33, %v5965_v52 }
 0xbe3   : > { %v7005_v0 = vpop.f32.mrf.mxu0 }
 0xbe4   : > { %v6123_v38 = vadd.f32 %v6122_v45, %v6048_v53 }
 0xbe6   : > { %v6126_v40 = vsel %vm464_vm1, %v6123_v38, 0.0 }
 0xbe7   : > { %6127 = vadd.xlane.f32.xlu1 %v6126_v40 }
 0xc70   : > { %v6128_v54 = vpop.xlane.xlu1 %6127 }
 0xc71   : > { %v6130_v55 = vmul.f32 0.03125, %v6128_v54 }
 0xc73   : > { %v6131_v57 = vsub.f32 %v6123_v38, %v6130_v55 }
 0xc75   : > { %v6132_v58 = vmul.f32 %v6131_v57, %v6131_v57 }
 0xc77   : > { %v6133_v59 = vsel %vm464_vm1, %v6132_v58, 0.0 }
 0xc78   : > { %6134 = vadd.xlane.f32.xlu0 %v6133_v59 }
 0xd01   : > { %v6135_v60 = vpop.xlane.xlu0 %6134 }
 0xd02   : > { %v6136_v61 = vmul.f32 0.03125, %v6135_v60 }
 0xd04   : > { %v6137_v62 = vadd.f32 1e-05, %v6136_v61 }
 0xd06   : > { %7078 = vrsqrt.f32 %v6137_v62 }
 0xd13   : > { %v7079_v63 = vpop.eup %7078 }
 0xd14   : > { %v6139_v2 = vmul.f32 %v7079_v63, %v6131_v57 }
 0xd16   : > { %v6146_v4 = vmul.f32 %v6293_v1, %v6139_v2 }
 0xd18   : > { %v6153_v6 = vadd.f32 %v6294_v3, %v6146_v4 }
 0xd1a   : > { %6154 = vst.msk [vmem:[%s451_s26] sm:$0xff] %vm464_vm1, %v6153_v6 }
 0xd1b PF: > { %s21_s15 = sadd.s32 1, %s7132_s15   ;;  %s7984_s13 = smov %s7128_s14 }
 0xd1c   : > { %p18_p2 = scmp.ge.s32.totalorder %s21_s15, 4   ;;  %s7985_s14 = smov %s7987_s17 }
 0xd1e   :  { %20 = sbr.rel (!%p18_p2) target bundleno = 2 (0x2), region = 108 }
 0xd23   :  { %6180 = vsyncpa [#allocation5], 1 }
 0xd24   :  { %6182 = vsyncpa [#allocation5 + $0x1], 1 }

</bundles_post_ra>
